<compile_context>
chip_gen: v7x
topology: tpu7x:2x2x1
jax: 0.10.0
libtpu: 0.0.40
codegen_flags: <defaults>
</compile_context>

<pallas_src>
import functools

import jax
import jax.numpy as jnp
from jax import lax
from jax.experimental import pallas as pl
from jax.experimental.pallas import tpu as pltpu


# ----------------------------- Pallas kernel --------------------------------

def _lstm_chunk_kernel(x_ref, wx_ref, uh_ref, b_ref, h0_ref, c0_ref,
                       hs_ref, hf_ref, cf_ref,
                       h_sc, c_sc, xw_sc,
                       *, hidden_dim, batch, t_chunk, seq_len):
    """Process one chunk of `t_chunk` timesteps. Grid axis 0 = chunk index."""
    chunk = pl.program_id(0)
    Hp, Bp, Tc = hidden_dim, batch, t_chunk

    # Load the initial state on the first chunk only; VMEM scratch carries it
    # across subsequent (sequential, "arbitrary") grid steps.
    @pl.when(chunk == 0)
    def _():
        h_sc[...] = h0_ref[...]
        c_sc[...] = c0_ref[...]

    # ---- hoisted input projection: one big bf16 MXU matmul per chunk -------
    # (Tc, Bp, Hp) -> (Tc*Bp, Hp); Bp is a multiple of 8 so the merge is free.
    # The result is parked in VMEM scratch (NOT kept live in vregs).
    x_chunk = x_ref[...].reshape(Tc * Bp, Hp).astype(wx_ref.dtype)
    xw_sc[...] = (jnp.dot(x_chunk, wx_ref[...],
                          preferred_element_type=jnp.float32)
                  + b_ref[...]).reshape(Tc, Bp, 4 * Hp)

    needs_mask = (seq_len % t_chunk) != 0   # static: only if L was padded

    # ---- sequential recurrence over the chunk -------------------------------
    def step(t, carry):
        h_prev, c_prev = carry
        # Recurrent matmul: read Uh through the ref each step (bounded live
        # range); bf16 operands, f32 accumulation.
        rec = jnp.dot(h_prev.astype(uh_ref.dtype), uh_ref[...],
                      preferred_element_type=jnp.float32)
        gates = xw_sc[t] + rec                                   # (Bp, 4Hp) f32
        # gate order: [f, i, o, c]; Hp multiple of 128 -> lane-aligned slices
        f_t = jax.nn.sigmoid(gates[:, 0 * Hp:1 * Hp])
        i_t = jax.nn.sigmoid(gates[:, 1 * Hp:2 * Hp])
        o_t = jax.nn.sigmoid(gates[:, 2 * Hp:3 * Hp])
        c_hat = jnp.tanh(gates[:, 3 * Hp:4 * Hp])

        c_new = f_t * c_prev + i_t * c_hat
        h_new = o_t * jnp.tanh(c_new)

        hs_ref[t] = h_new.astype(hs_ref.dtype)   # full (Bp, Hp) lane-dense store

        if needs_mask:
            # Steps past the true sequence length (time padding) must not
            # advance the carried state; their hs rows are sliced off outside.
            valid = (chunk * Tc + t) < seq_len
            h_new = jnp.where(valid, h_new, h_prev)
            c_new = jnp.where(valid, c_new, c_prev)
        return h_new, c_new

    h_t, c_t = lax.fori_loop(0, Tc, step, (h_sc[...], c_sc[...]), unroll=True)

    # Carry state to the next chunk.
    h_sc[...] = h_t
    c_sc[...] = c_t

    # Final (h, c): write only once, on the last chunk.
    @pl.when(chunk == pl.num_programs(0) - 1)
    def _():
        hf_ref[...] = h_t.astype(hf_ref.dtype)
        cf_ref[...] = c_t.astype(cf_ref.dtype)


# ------------------------------ host wrapper ---------------------------------

def _round_up(n, m):
    return ((n + m - 1) // m) * m


def pack_params(raw, hidden_dim, *, weight_dtype=jnp.bfloat16):
    """Pack the 4 gate Linears into padded (Hp, 4Hp) matrices, gate order f,i,o,c.

    Padding rows/cols are zero, so padded hidden positions stay exactly zero
    and contribute nothing to the valid region. Weights are stored in bf16
    (MXU-native); the bias stays f32 and is added after the f32 accumulation.
    """
    H = hidden_dim
    Hp = max(_round_up(H, 128), 128)

    def pad_w(w):  # w: (H, H) nn.Linear weight (out, in); forward computes x @ w.T
        return jnp.zeros((Hp, Hp), jnp.float32).at[:H, :H].set(w.T)

    def pad_b(v):
        return jnp.zeros((Hp,), jnp.float32).at[:H].set(v)

    wx = jnp.concatenate([pad_w(w) for w in raw["W"]], axis=1).astype(weight_dtype)
    uh = jnp.concatenate([pad_w(u) for u in raw["U"]], axis=1).astype(weight_dtype)
    b = jnp.concatenate([pad_b(v) for v in raw["bU"]], axis=0).reshape(1, 4 * Hp)
    return {"wx": wx, "uh": uh, "b": b, "Hp": Hp, "H": H}


def lstm_block_forward(x_blh, packed, prev_states=None, *, max_chunk=32):
    """LSTMBlock.forward: x (B, L, H) -> (hidden_states (B, L, H), (h_T, c_T))."""
    B, L, H = x_blh.shape
    Hp = packed["Hp"]
    Bp = max(_round_up(B, 8), 8)

    # Time chunk: pad L up to a multiple of the chunk (masked tail) so awkward
    # lengths never fall back to a 1-step grid.
    tc = min(max_chunk, L)
    Lp = _round_up(L, tc)
    n_chunks = Lp // tc

    # Time-major + pad to chunk/sublane/lane-aligned shapes (f32 stream; the
    # kernel casts the matmul LHS to the weight dtype).
    x = jnp.transpose(x_blh, (1, 0, 2)).astype(jnp.float32)          # (L, B, H)
    x = jnp.pad(x, ((0, Lp - L), (0, Bp - B), (0, Hp - H)))

    if prev_states is None:
        h0 = jnp.zeros((Bp, Hp), jnp.float32)
        c0 = jnp.zeros((Bp, Hp), jnp.float32)
    else:
        h_in, c_in = prev_states
        h0 = jnp.pad(h_in.astype(jnp.float32), ((0, Bp - B), (0, Hp - H)))
        c0 = jnp.pad(c_in.astype(jnp.float32), ((0, Bp - B), (0, Hp - H)))

    kernel = functools.partial(_lstm_chunk_kernel,
                               hidden_dim=Hp, batch=Bp, t_chunk=tc, seq_len=L)

    # Grid-invariant operands: constant index_map -> single-buffered.
    single = pl.Buffered(1)

    hs, h_f, c_f = pl.pallas_call(
        kernel,
        out_shape=(jax.ShapeDtypeStruct((Lp, Bp, Hp), jnp.float32),   # hidden states
                   jax.ShapeDtypeStruct((Bp, Hp), jnp.float32),       # final h
                   jax.ShapeDtypeStruct((Bp, Hp), jnp.float32)),      # final c
        grid_spec=pltpu.PrefetchScalarGridSpec(
            num_scalar_prefetch=0,
            grid=(n_chunks,),
            in_specs=[
                pl.BlockSpec((tc, Bp, Hp), lambda i: (i, 0, 0)),          # x chunk
                pl.BlockSpec((Hp, 4 * Hp), lambda i: (0, 0),
                             pipeline_mode=single),                       # Wx
                pl.BlockSpec((Hp, 4 * Hp), lambda i: (0, 0),
                             pipeline_mode=single),                       # Uh
                pl.BlockSpec((1, 4 * Hp), lambda i: (0, 0),
                             pipeline_mode=single),                       # bias
                pl.BlockSpec((Bp, Hp), lambda i: (0, 0),
                             pipeline_mode=single),                       # h0
                pl.BlockSpec((Bp, Hp), lambda i: (0, 0),
                             pipeline_mode=single),                       # c0
            ],
            out_specs=(
                pl.BlockSpec((tc, Bp, Hp), lambda i: (i, 0, 0)),          # hidden states
                pl.BlockSpec((Bp, Hp), lambda i: (0, 0)),                 # final h
                pl.BlockSpec((Bp, Hp), lambda i: (0, 0)),                 # final c
            ),
            scratch_shapes=[
                pltpu.VMEM((Bp, Hp), jnp.float32),             # h carry
                pltpu.VMEM((Bp, Hp), jnp.float32),             # c carry
                pltpu.VMEM((tc, Bp, 4 * Hp), jnp.float32),     # hoisted x@Wx + b
            ]),
        compiler_params=pltpu.CompilerParams(
            dimension_semantics=("arbitrary",),                # serial recurrence
            vmem_limit_bytes=32 * 1024 * 1024),
    )(x, packed["wx"], packed["uh"], packed["b"], h0, c0)

    hidden_states = jnp.transpose(hs[:L, :B, :H], (1, 0, 2))          # (B, L, H)
    return hidden_states, (h_f[:B, :H], c_f[:B, :H])


# ------------------------- parameters & reference ---------------------------

def init_params(key, hidden_dim):
    """PyTorch-style init: each Linear ~ U(-1/sqrt(H), 1/sqrt(H))."""
    bound = 1.0 / (hidden_dim ** 0.5)
    sub = jax.random.split(key, 12)
    W = [jax.random.uniform(sub[g], (hidden_dim, hidden_dim),
                            jnp.float32, -bound, bound) for g in range(4)]   # W_f,i,o,c
    U = [jax.random.uniform(sub[4 + g], (hidden_dim, hidden_dim),
                            jnp.float32, -bound, bound) for g in range(4)]   # U_f,i,o,c
    bU = [jax.random.uniform(sub[8 + g], (hidden_dim,),
                             jnp.float32, -bound, bound) for g in range(4)]  # U_* biases
    return {"W": W, "U": U, "bU": bU}


def lstm_block_ref(x_blh, raw, prev_states=None, *, matmul_dtype=jnp.float32):
    """Pure-JAX reference mirroring the PyTorch LSTMBlock.forward.

    `matmul_dtype` controls the matmul-input precision so the reference can be
    matched bit-for-bit (up to accumulation order) against the bf16 kernel.
    """
    B, L, H = x_blh.shape
    if prev_states is None:
        h_t = jnp.zeros((B, H), jnp.float32)
        c_t = jnp.zeros((B, H), jnp.float32)
    else:
        h_t, c_t = prev_states
        h_t = h_t.astype(jnp.float32)
        c_t = c_t.astype(jnp.float32)

    def mm(a, w):  # a @ w.T, f32 accumulation
        return jnp.dot(a.astype(matmul_dtype), w.T.astype(matmul_dtype),
                       preferred_element_type=jnp.float32)

    Wf, Wi, Wo, Wc = raw["W"]
    Uf, Ui, Uo, Uc = raw["U"]
    bf, bi, bo, bc = raw["bU"]
    hs = []
    for t in range(L):
        x_t = x_blh[:, t, :]
        f = jax.nn.sigmoid(mm(x_t, Wf) + mm(h_t, Uf) + bf)
        i = jax.nn.sigmoid(mm(x_t, Wi) + mm(h_t, Ui) + bi)
        o = jax.nn.sigmoid(mm(x_t, Wo) + mm(h_t, Uo) + bo)
        ch = jnp.tanh(mm(x_t, Wc) + mm(h_t, Uc) + bc)
        c_t = f * c_t + i * ch
        h_t = o * jnp.tanh(c_t)
        hs.append(h_t)
    return jnp.stack(hs, axis=1), (h_t, c_t)


# ----------------------------------- main ------------------------------------

if __name__ == "__main__":
    key = jax.random.PRNGKey(0)
    k1, k2, k3, k4, k5 = jax.random.split(key, 5)

    # ---- Case 1: zero initial state --------------------------------------
    B, L, H = 2, 8, 32
    x = jax.random.normal(k1, (B, L, H), dtype=jnp.float32)
    raw = init_params(k2, H)
    packed = pack_params(raw, H)

    hs, (h_f, c_f) = lstm_block_forward(x, packed)
    hs, h_f, c_f = jax.block_until_ready((hs, h_f, c_f))
    assert hs.shape == (B, L, H)

    # Precision-matched reference (bf16 matmul inputs, f32 accumulation):
    # remaining differences are accumulation order only.
    hs_r, (hf_r, cf_r) = lstm_block_ref(x, raw, matmul_dtype=jnp.bfloat16)
    assert jnp.allclose(hs, hs_r, atol=5e-3, rtol=5e-3), "hidden states mismatch"
    assert jnp.allclose(h_f, hf_r, atol=5e-3, rtol=5e-3), "final h mismatch"
    assert jnp.allclose(c_f, cf_r, atol=5e-3, rtol=5e-3), "final c mismatch"

    # Full-f32 reference: bounds the bf16 weight-cast error.
    hs_f32, _ = lstm_block_ref(x, raw, matmul_dtype=jnp.float32)
    assert jnp.allclose(hs, hs_f32, atol=5e-2, rtol=5e-2), "bf16 error too large"

    # ---- Case 2: carried-in state, ragged batch & length (masked tail) ----
    B2, L2 = 3, 11
    x2 = jax.random.normal(k3, (B2, L2, H), dtype=jnp.float32)
    h0 = 0.5 * jax.random.normal(k4, (B2, H), dtype=jnp.float32)
    c0 = 0.5 * jax.random.normal(k5, (B2, H), dtype=jnp.float32)

    hs2, (hf2, cf2) = lstm_block_forward(x2, packed, prev_states=(h0, c0),
                                         max_chunk=4)   # 3 chunks, padded tail
    hs2, hf2, cf2 = jax.block_until_ready((hs2, hf2, cf2))
    hs2_r, (hf2_r, cf2_r) = lstm_block_ref(x2, raw, prev_states=(h0, c0),
                                           matmul_dtype=jnp.bfloat16)
    assert hs2.shape == (B2, L2, H)
    assert jnp.allclose(hs2, hs2_r, atol=5e-3, rtol=5e-3), "case2 hidden states mismatch"
    assert jnp.allclose(hf2, hf2_r, atol=5e-3, rtol=5e-3), "case2 final h mismatch"
    assert jnp.allclose(cf2, cf2_r, atol=5e-3, rtol=5e-3), "case2 final c mismatch"

    print("KERNEL_OK")
</pallas_src>

<mosaic_0001>
module attributes {stable_mosaic.version = 11 : i64} {
  func.func @_lstm_chunk_kernel(%arg0: i32, %arg1: memref<8x8x128xf32, #tpu.memory_space<vmem>>, %arg2: memref<128x512xbf16, #tpu.memory_space<vmem>>, %arg3: memref<128x512xbf16, #tpu.memory_space<vmem>>, %arg4: memref<1x512xf32, #tpu.memory_space<vmem>>, %arg5: memref<8x128xf32, #tpu.memory_space<vmem>>, %arg6: memref<8x128xf32, #tpu.memory_space<vmem>>, %arg7: memref<8x8x128xf32, #tpu.memory_space<vmem>>, %arg8: memref<8x128xf32, #tpu.memory_space<vmem>>, %arg9: memref<8x128xf32, #tpu.memory_space<vmem>>, %arg10: memref<8x128xf32, #tpu.memory_space<vmem>>, %arg11: memref<8x128xf32, #tpu.memory_space<vmem>>, %arg12: memref<8x8x512xf32, #tpu.memory_space<vmem>>) attributes {dimension_semantics = [#tpu.dimension_semantics<arbitrary>], iteration_bounds = array<i64: 1>, scalar_prefetch = 0 : i64, scratch_operands = 3 : i64, tpu.core_type = #tpu.core_type<tc>, window_params = [{transform_indices = @transform_0, window_bounds = array<i64: 8, 8, 128>}, {pipeline_mode = #tpu.pipeline_mode<synchronous>, transform_indices = @transform_1, window_bounds = array<i64: 128, 512>}, {pipeline_mode = #tpu.pipeline_mode<synchronous>, transform_indices = @transform_2, window_bounds = array<i64: 128, 512>}, {pipeline_mode = #tpu.pipeline_mode<synchronous>, transform_indices = @transform_3, window_bounds = array<i64: 1, 512>}, {pipeline_mode = #tpu.pipeline_mode<synchronous>, transform_indices = @transform_4, window_bounds = array<i64: 8, 128>}, {pipeline_mode = #tpu.pipeline_mode<synchronous>, transform_indices = @transform_5, window_bounds = array<i64: 8, 128>}, {transform_indices = @transform_6, window_bounds = array<i64: 8, 8, 128>}, {pipeline_mode = #tpu.pipeline_mode<synchronous>, transform_indices = @transform_7, window_bounds = array<i64: 8, 128>}, {pipeline_mode = #tpu.pipeline_mode<synchronous>, transform_indices = @transform_8, window_bounds = array<i64: 8, 128>}]} {
    %c0_i32 = arith.constant 0 : i32
    %0 = arith.cmpi eq, %arg0, %c0_i32 : i32
    %1 = arith.extui %0 : i1 to i32
    %c0_i32_0 = arith.constant 0 : i32
    %2 = arith.cmpi ne, %1, %c0_i32_0 : i32
    scf.if %2 {
      %c0_101 = arith.constant 0 : index
      %c0_102 = arith.constant 0 : index
      %308 = vector.load %arg5[%c0_101, %c0_102] : memref<8x128xf32, #tpu.memory_space<vmem>>, vector<8x128xf32>
      %c0_103 = arith.constant 0 : index
      %c0_104 = arith.constant 0 : index
      %309 = vector.load %arg10[%c0_103, %c0_104] : memref<8x128xf32, #tpu.memory_space<vmem>>, vector<8x128xf32>
      tpu.vector_store %arg10[%c0_103, %c0_104], %308 {strides = array<i32>} : memref<8x128xf32, #tpu.memory_space<vmem>>, vector<8x128xf32>,
      %c0_105 = arith.constant 0 : index
      %c0_106 = arith.constant 0 : index
      %310 = vector.load %arg6[%c0_105, %c0_106] : memref<8x128xf32, #tpu.memory_space<vmem>>, vector<8x128xf32>
      %c0_107 = arith.constant 0 : index
      %c0_108 = arith.constant 0 : index
      %311 = vector.load %arg11[%c0_107, %c0_108] : memref<8x128xf32, #tpu.memory_space<vmem>>, vector<8x128xf32>
      tpu.vector_store %arg11[%c0_107, %c0_108], %310 {strides = array<i32>} : memref<8x128xf32, #tpu.memory_space<vmem>>, vector<8x128xf32>,
    } else {
    }
    %c0 = arith.constant 0 : index
    %c0_1 = arith.constant 0 : index
    %c0_2 = arith.constant 0 : index
    %3 = vector.load %arg1[%c0, %c0_1, %c0_2] : memref<8x8x128xf32, #tpu.memory_space<vmem>>, vector<8x8x128xf32>
    %4 = vector.shape_cast %3 : vector<8x8x128xf32> to vector<64x128xf32>
    %5 = arith.truncf %4 : vector<64x128xf32> to vector<64x128xbf16>
    %c0_3 = arith.constant 0 : index
    %c0_4 = arith.constant 0 : index
    %6 = vector.load %arg2[%c0_3, %c0_4] : memref<128x512xbf16, #tpu.memory_space<vmem>>, vector<128x512xbf16>
    %cst = arith.constant dense<0.000000e+00> : vector<64x512xf32>
    %7 = tpu.matmul %5, %6, %cst {dimension_numbers = #tpu.dot_dimension_numbers<[1], [0], [0], [1], [0, 0, 1, 1], [], []>} : vector<64x128xbf16>, vector<128x512xbf16>, vector<64x512xf32> -> vector<64x512xf32>
    %c0_5 = arith.constant 0 : index
    %c0_6 = arith.constant 0 : index
    %8 = vector.load %arg4[%c0_5, %c0_6] : memref<1x512xf32, #tpu.memory_space<vmem>>, vector<1x512xf32>
    %9 = vector.broadcast %8 : vector<1x512xf32> to vector<64x512xf32>
    %10 = arith.addf %7, %9 : vector<64x512xf32>
    %11 = vector.shape_cast %10 : vector<64x512xf32> to vector<8x8x512xf32>
    %c0_7 = arith.constant 0 : index
    %c0_8 = arith.constant 0 : index
    %c0_9 = arith.constant 0 : index
    %12 = vector.load %arg12[%c0_7, %c0_8, %c0_9] : memref<8x8x512xf32, #tpu.memory_space<vmem>>, vector<8x8x512xf32>
    tpu.vector_store %arg12[%c0_7, %c0_8, %c0_9], %11 {strides = array<i32>} : memref<8x8x512xf32, #tpu.memory_space<vmem>>, vector<8x8x512xf32>,
    %c0_10 = arith.constant 0 : index
    %c0_11 = arith.constant 0 : index
    %13 = vector.load %arg10[%c0_10, %c0_11] : memref<8x128xf32, #tpu.memory_space<vmem>>, vector<8x128xf32>
    %c0_12 = arith.constant 0 : index
    %c0_13 = arith.constant 0 : index
    %14 = vector.load %arg11[%c0_12, %c0_13] : memref<8x128xf32, #tpu.memory_space<vmem>>, vector<8x128xf32>
    %c0_i32_14 = arith.constant 0 : i32
    %15 = arith.truncf %13 : vector<8x128xf32> to vector<8x128xbf16>
    %c0_15 = arith.constant 0 : index
    %c0_16 = arith.constant 0 : index
    %16 = vector.load %arg3[%c0_15, %c0_16] : memref<128x512xbf16, #tpu.memory_space<vmem>>, vector<128x512xbf16>
    %cst_17 = arith.constant dense<0.000000e+00> : vector<8x512xf32>
    %17 = tpu.matmul %15, %16, %cst_17 {dimension_numbers = #tpu.dot_dimension_numbers<[1], [0], [0], [1], [0, 0, 1, 1], [], []>} : vector<8x128xbf16>, vector<128x512xbf16>, vector<8x512xf32> -> vector<8x512xf32>
    %18 = arith.index_cast %c0_i32_14 : i32 to index
    %c0_18 = arith.constant 0 : index
    %c0_19 = arith.constant 0 : index
    %19 = vector.load %arg12[%18, %c0_18, %c0_19] : memref<8x8x512xf32, #tpu.memory_space<vmem>>, vector<1x8x512xf32>
    %20 = vector.shape_cast %19 : vector<1x8x512xf32> to vector<8x512xf32>
    %21 = arith.addf %20, %17 : vector<8x512xf32>
    %22 = vector.extract_strided_slice %21 {offsets = [0, 0], sizes = [8, 128], strides = [1, 1]} : vector<8x512xf32> to vector<8x128xf32>
    %23 = arith.negf %22 : vector<8x128xf32>
    %24 = math.exp %23 : vector<8x128xf32>
    %cst_20 = arith.constant 1.000000e+00 : f32
    %25 = vector.broadcast %cst_20 : f32 to vector<8x128xf32>
    %26 = arith.addf %25, %24 : vector<8x128xf32>
    %27 = arith.divf %25, %26 : vector<8x128xf32>
    %28 = vector.extract_strided_slice %21 {offsets = [0, 128], sizes = [8, 128], strides = [1, 1]} : vector<8x512xf32> to vector<8x128xf32>
    %29 = arith.negf %28 : vector<8x128xf32>
    %30 = math.exp %29 : vector<8x128xf32>
    %cst_21 = arith.constant 1.000000e+00 : f32
    %31 = vector.broadcast %cst_21 : f32 to vector<8x128xf32>
    %32 = arith.addf %31, %30 : vector<8x128xf32>
    %33 = arith.divf %31, %32 : vector<8x128xf32>
    %34 = vector.extract_strided_slice %21 {offsets = [0, 256], sizes = [8, 128], strides = [1, 1]} : vector<8x512xf32> to vector<8x128xf32>
    %35 = arith.negf %34 : vector<8x128xf32>
    %36 = math.exp %35 : vector<8x128xf32>
    %cst_22 = arith.constant 1.000000e+00 : f32
    %37 = vector.broadcast %cst_22 : f32 to vector<8x128xf32>
    %38 = arith.addf %37, %36 : vector<8x128xf32>
    %39 = arith.divf %37, %38 : vector<8x128xf32>
    %40 = vector.extract_strided_slice %21 {offsets = [0, 384], sizes = [8, 128], strides = [1, 1]} : vector<8x512xf32> to vector<8x128xf32>
    %41 = math.tanh %40 : vector<8x128xf32>
    %42 = arith.mulf %27, %14 : vector<8x128xf32>
    %43 = arith.mulf %33, %41 : vector<8x128xf32>
    %44 = arith.addf %42, %43 : vector<8x128xf32>
    %45 = math.tanh %44 : vector<8x128xf32>
    %46 = arith.mulf %39, %45 : vector<8x128xf32>
    %47 = arith.index_cast %c0_i32_14 : i32 to index
    %c0_23 = arith.constant 0 : index
    %c0_24 = arith.constant 0 : index
    %48 = vector.load %arg7[%47, %c0_23, %c0_24] : memref<8x8x128xf32, #tpu.memory_space<vmem>>, vector<1x8x128xf32>
    %49 = vector.shape_cast %48 : vector<1x8x128xf32> to vector<8x128xf32>
    %50 = vector.shape_cast %46 : vector<8x128xf32> to vector<1x8x128xf32>
    tpu.vector_store %arg7[%47, %c0_23, %c0_24], %50 {strides = array<i32>} : memref<8x8x128xf32, #tpu.memory_space<vmem>>, vector<1x8x128xf32>,
    %c1_i32 = arith.constant 1 : i32
    %51 = arith.truncf %46 : vector<8x128xf32> to vector<8x128xbf16>
    %c0_25 = arith.constant 0 : index
    %c0_26 = arith.constant 0 : index
    %52 = vector.load %arg3[%c0_25, %c0_26] : memref<128x512xbf16, #tpu.memory_space<vmem>>, vector<128x512xbf16>
    %cst_27 = arith.constant dense<0.000000e+00> : vector<8x512xf32>
    %53 = tpu.matmul %51, %52, %cst_27 {dimension_numbers = #tpu.dot_dimension_numbers<[1], [0], [0], [1], [0, 0, 1, 1], [], []>} : vector<8x128xbf16>, vector<128x512xbf16>, vector<8x512xf32> -> vector<8x512xf32>
    %54 = arith.index_cast %c1_i32 : i32 to index
    %c0_28 = arith.constant 0 : index
    %c0_29 = arith.constant 0 : index
    %55 = vector.load %arg12[%54, %c0_28, %c0_29] : memref<8x8x512xf32, #tpu.memory_space<vmem>>, vector<1x8x512xf32>
    %56 = vector.shape_cast %55 : vector<1x8x512xf32> to vector<8x512xf32>
    %57 = arith.addf %56, %53 : vector<8x512xf32>
    %58 = vector.extract_strided_slice %57 {offsets = [0, 0], sizes = [8, 128], strides = [1, 1]} : vector<8x512xf32> to vector<8x128xf32>
    %59 = arith.negf %58 : vector<8x128xf32>
    %60 = math.exp %59 : vector<8x128xf32>
    %cst_30 = arith.constant 1.000000e+00 : f32
    %61 = vector.broadcast %cst_30 : f32 to vector<8x128xf32>
    %62 = arith.addf %61, %60 : vector<8x128xf32>
    %63 = arith.divf %61, %62 : vector<8x128xf32>
    %64 = vector.extract_strided_slice %57 {offsets = [0, 128], sizes = [8, 128], strides = [1, 1]} : vector<8x512xf32> to vector<8x128xf32>
    %65 = arith.negf %64 : vector<8x128xf32>
    %66 = math.exp %65 : vector<8x128xf32>
    %cst_31 = arith.constant 1.000000e+00 : f32
    %67 = vector.broadcast %cst_31 : f32 to vector<8x128xf32>
    %68 = arith.addf %67, %66 : vector<8x128xf32>
    %69 = arith.divf %67, %68 : vector<8x128xf32>
    %70 = vector.extract_strided_slice %57 {offsets = [0, 256], sizes = [8, 128], strides = [1, 1]} : vector<8x512xf32> to vector<8x128xf32>
    %71 = arith.negf %70 : vector<8x128xf32>
    %72 = math.exp %71 : vector<8x128xf32>
    %cst_32 = arith.constant 1.000000e+00 : f32
    %73 = vector.broadcast %cst_32 : f32 to vector<8x128xf32>
    %74 = arith.addf %73, %72 : vector<8x128xf32>
    %75 = arith.divf %73, %74 : vector<8x128xf32>
    %76 = vector.extract_strided_slice %57 {offsets = [0, 384], sizes = [8, 128], strides = [1, 1]} : vector<8x512xf32> to vector<8x128xf32>
    %77 = math.tanh %76 : vector<8x128xf32>
    %78 = arith.mulf %63, %44 : vector<8x128xf32>
    %79 = arith.mulf %69, %77 : vector<8x128xf32>
    %80 = arith.addf %78, %79 : vector<8x128xf32>
    %81 = math.tanh %80 : vector<8x128xf32>
    %82 = arith.mulf %75, %81 : vector<8x128xf32>
    %83 = arith.index_cast %c1_i32 : i32 to index
    %c0_33 = arith.constant 0 : index
    %c0_34 = arith.constant 0 : index
    %84 = vector.load %arg7[%83, %c0_33, %c0_34] : memref<8x8x128xf32, #tpu.memory_space<vmem>>, vector<1x8x128xf32>
    %85 = vector.shape_cast %84 : vector<1x8x128xf32> to vector<8x128xf32>
    %86 = vector.shape_cast %82 : vector<8x128xf32> to vector<1x8x128xf32>
    tpu.vector_store %arg7[%83, %c0_33, %c0_34], %86 {strides = array<i32>} : memref<8x8x128xf32, #tpu.memory_space<vmem>>, vector<1x8x128xf32>,
    %c2_i32 = arith.constant 2 : i32
    %87 = arith.truncf %82 : vector<8x128xf32> to vector<8x128xbf16>
    %c0_35 = arith.constant 0 : index
    %c0_36 = arith.constant 0 : index
    %88 = vector.load %arg3[%c0_35, %c0_36] : memref<128x512xbf16, #tpu.memory_space<vmem>>, vector<128x512xbf16>
    %cst_37 = arith.constant dense<0.000000e+00> : vector<8x512xf32>
    %89 = tpu.matmul %87, %88, %cst_37 {dimension_numbers = #tpu.dot_dimension_numbers<[1], [0], [0], [1], [0, 0, 1, 1], [], []>} : vector<8x128xbf16>, vector<128x512xbf16>, vector<8x512xf32> -> vector<8x512xf32>
    %90 = arith.index_cast %c2_i32 : i32 to index
    %c0_38 = arith.constant 0 : index
    %c0_39 = arith.constant 0 : index
    %91 = vector.load %arg12[%90, %c0_38, %c0_39] : memref<8x8x512xf32, #tpu.memory_space<vmem>>, vector<1x8x512xf32>
    %92 = vector.shape_cast %91 : vector<1x8x512xf32> to vector<8x512xf32>
    %93 = arith.addf %92, %89 : vector<8x512xf32>
    %94 = vector.extract_strided_slice %93 {offsets = [0, 0], sizes = [8, 128], strides = [1, 1]} : vector<8x512xf32> to vector<8x128xf32>
    %95 = arith.negf %94 : vector<8x128xf32>
    %96 = math.exp %95 : vector<8x128xf32>
    %cst_40 = arith.constant 1.000000e+00 : f32
    %97 = vector.broadcast %cst_40 : f32 to vector<8x128xf32>
    %98 = arith.addf %97, %96 : vector<8x128xf32>
    %99 = arith.divf %97, %98 : vector<8x128xf32>
    %100 = vector.extract_strided_slice %93 {offsets = [0, 128], sizes = [8, 128], strides = [1, 1]} : vector<8x512xf32> to vector<8x128xf32>
    %101 = arith.negf %100 : vector<8x128xf32>
    %102 = math.exp %101 : vector<8x128xf32>
    %cst_41 = arith.constant 1.000000e+00 : f32
    %103 = vector.broadcast %cst_41 : f32 to vector<8x128xf32>
    %104 = arith.addf %103, %102 : vector<8x128xf32>
    %105 = arith.divf %103, %104 : vector<8x128xf32>
    %106 = vector.extract_strided_slice %93 {offsets = [0, 256], sizes = [8, 128], strides = [1, 1]} : vector<8x512xf32> to vector<8x128xf32>
    %107 = arith.negf %106 : vector<8x128xf32>
    %108 = math.exp %107 : vector<8x128xf32>
    %cst_42 = arith.constant 1.000000e+00 : f32
    %109 = vector.broadcast %cst_42 : f32 to vector<8x128xf32>
    %110 = arith.addf %109, %108 : vector<8x128xf32>
    %111 = arith.divf %109, %110 : vector<8x128xf32>
    %112 = vector.extract_strided_slice %93 {offsets = [0, 384], sizes = [8, 128], strides = [1, 1]} : vector<8x512xf32> to vector<8x128xf32>
    %113 = math.tanh %112 : vector<8x128xf32>
    %114 = arith.mulf %99, %80 : vector<8x128xf32>
    %115 = arith.mulf %105, %113 : vector<8x128xf32>
    %116 = arith.addf %114, %115 : vector<8x128xf32>
    %117 = math.tanh %116 : vector<8x128xf32>
    %118 = arith.mulf %111, %117 : vector<8x128xf32>
    %119 = arith.index_cast %c2_i32 : i32 to index
    %c0_43 = arith.constant 0 : index
    %c0_44 = arith.constant 0 : index
    %120 = vector.load %arg7[%119, %c0_43, %c0_44] : memref<8x8x128xf32, #tpu.memory_space<vmem>>, vector<1x8x128xf32>
    %121 = vector.shape_cast %120 : vector<1x8x128xf32> to vector<8x128xf32>
    %122 = vector.shape_cast %118 : vector<8x128xf32> to vector<1x8x128xf32>
    tpu.vector_store %arg7[%119, %c0_43, %c0_44], %122 {strides = array<i32>} : memref<8x8x128xf32, #tpu.memory_space<vmem>>, vector<1x8x128xf32>,
    %c3_i32 = arith.constant 3 : i32
    %123 = arith.truncf %118 : vector<8x128xf32> to vector<8x128xbf16>
    %c0_45 = arith.constant 0 : index
    %c0_46 = arith.constant 0 : index
    %124 = vector.load %arg3[%c0_45, %c0_46] : memref<128x512xbf16, #tpu.memory_space<vmem>>, vector<128x512xbf16>
    %cst_47 = arith.constant dense<0.000000e+00> : vector<8x512xf32>
    %125 = tpu.matmul %123, %124, %cst_47 {dimension_numbers = #tpu.dot_dimension_numbers<[1], [0], [0], [1], [0, 0, 1, 1], [], []>} : vector<8x128xbf16>, vector<128x512xbf16>, vector<8x512xf32> -> vector<8x512xf32>
    %126 = arith.index_cast %c3_i32 : i32 to index
    %c0_48 = arith.constant 0 : index
    %c0_49 = arith.constant 0 : index
    %127 = vector.load %arg12[%126, %c0_48, %c0_49] : memref<8x8x512xf32, #tpu.memory_space<vmem>>, vector<1x8x512xf32>
    %128 = vector.shape_cast %127 : vector<1x8x512xf32> to vector<8x512xf32>
    %129 = arith.addf %128, %125 : vector<8x512xf32>
    %130 = vector.extract_strided_slice %129 {offsets = [0, 0], sizes = [8, 128], strides = [1, 1]} : vector<8x512xf32> to vector<8x128xf32>
    %131 = arith.negf %130 : vector<8x128xf32>
    %132 = math.exp %131 : vector<8x128xf32>
    %cst_50 = arith.constant 1.000000e+00 : f32
    %133 = vector.broadcast %cst_50 : f32 to vector<8x128xf32>
    %134 = arith.addf %133, %132 : vector<8x128xf32>
    %135 = arith.divf %133, %134 : vector<8x128xf32>
    %136 = vector.extract_strided_slice %129 {offsets = [0, 128], sizes = [8, 128], strides = [1, 1]} : vector<8x512xf32> to vector<8x128xf32>
    %137 = arith.negf %136 : vector<8x128xf32>
    %138 = math.exp %137 : vector<8x128xf32>
    %cst_51 = arith.constant 1.000000e+00 : f32
    %139 = vector.broadcast %cst_51 : f32 to vector<8x128xf32>
    %140 = arith.addf %139, %138 : vector<8x128xf32>
    %141 = arith.divf %139, %140 : vector<8x128xf32>
    %142 = vector.extract_strided_slice %129 {offsets = [0, 256], sizes = [8, 128], strides = [1, 1]} : vector<8x512xf32> to vector<8x128xf32>
    %143 = arith.negf %142 : vector<8x128xf32>
    %144 = math.exp %143 : vector<8x128xf32>
    %cst_52 = arith.constant 1.000000e+00 : f32
    %145 = vector.broadcast %cst_52 : f32 to vector<8x128xf32>
    %146 = arith.addf %145, %144 : vector<8x128xf32>
    %147 = arith.divf %145, %146 : vector<8x128xf32>
    %148 = vector.extract_strided_slice %129 {offsets = [0, 384], sizes = [8, 128], strides = [1, 1]} : vector<8x512xf32> to vector<8x128xf32>
    %149 = math.tanh %148 : vector<8x128xf32>
    %150 = arith.mulf %135, %116 : vector<8x128xf32>
    %151 = arith.mulf %141, %149 : vector<8x128xf32>
    %152 = arith.addf %150, %151 : vector<8x128xf32>
    %153 = math.tanh %152 : vector<8x128xf32>
    %154 = arith.mulf %147, %153 : vector<8x128xf32>
    %155 = arith.index_cast %c3_i32 : i32 to index
    %c0_53 = arith.constant 0 : index
    %c0_54 = arith.constant 0 : index
    %156 = vector.load %arg7[%155, %c0_53, %c0_54] : memref<8x8x128xf32, #tpu.memory_space<vmem>>, vector<1x8x128xf32>
    %157 = vector.shape_cast %156 : vector<1x8x128xf32> to vector<8x128xf32>
    %158 = vector.shape_cast %154 : vector<8x128xf32> to vector<1x8x128xf32>
    tpu.vector_store %arg7[%155, %c0_53, %c0_54], %158 {strides = array<i32>} : memref<8x8x128xf32, #tpu.memory_space<vmem>>, vector<1x8x128xf32>,
    %c4_i32 = arith.constant 4 : i32
    %159 = arith.truncf %154 : vector<8x128xf32> to vector<8x128xbf16>
    %c0_55 = arith.constant 0 : index
    %c0_56 = arith.constant 0 : index
    %160 = vector.load %arg3[%c0_55, %c0_56] : memref<128x512xbf16, #tpu.memory_space<vmem>>, vector<128x512xbf16>
    %cst_57 = arith.constant dense<0.000000e+00> : vector<8x512xf32>
    %161 = tpu.matmul %159, %160, %cst_57 {dimension_numbers = #tpu.dot_dimension_numbers<[1], [0], [0], [1], [0, 0, 1, 1], [], []>} : vector<8x128xbf16>, vector<128x512xbf16>, vector<8x512xf32> -> vector<8x512xf32>
    %162 = arith.index_cast %c4_i32 : i32 to index
    %c0_58 = arith.constant 0 : index
    %c0_59 = arith.constant 0 : index
    %163 = vector.load %arg12[%162, %c0_58, %c0_59] : memref<8x8x512xf32, #tpu.memory_space<vmem>>, vector<1x8x512xf32>
    %164 = vector.shape_cast %163 : vector<1x8x512xf32> to vector<8x512xf32>
    %165 = arith.addf %164, %161 : vector<8x512xf32>
    %166 = vector.extract_strided_slice %165 {offsets = [0, 0], sizes = [8, 128], strides = [1, 1]} : vector<8x512xf32> to vector<8x128xf32>
    %167 = arith.negf %166 : vector<8x128xf32>
    %168 = math.exp %167 : vector<8x128xf32>
    %cst_60 = arith.constant 1.000000e+00 : f32
    %169 = vector.broadcast %cst_60 : f32 to vector<8x128xf32>
    %170 = arith.addf %169, %168 : vector<8x128xf32>
    %171 = arith.divf %169, %170 : vector<8x128xf32>
    %172 = vector.extract_strided_slice %165 {offsets = [0, 128], sizes = [8, 128], strides = [1, 1]} : vector<8x512xf32> to vector<8x128xf32>
    %173 = arith.negf %172 : vector<8x128xf32>
    %174 = math.exp %173 : vector<8x128xf32>
    %cst_61 = arith.constant 1.000000e+00 : f32
    %175 = vector.broadcast %cst_61 : f32 to vector<8x128xf32>
    %176 = arith.addf %175, %174 : vector<8x128xf32>
    %177 = arith.divf %175, %176 : vector<8x128xf32>
    %178 = vector.extract_strided_slice %165 {offsets = [0, 256], sizes = [8, 128], strides = [1, 1]} : vector<8x512xf32> to vector<8x128xf32>
    %179 = arith.negf %178 : vector<8x128xf32>
    %180 = math.exp %179 : vector<8x128xf32>
    %cst_62 = arith.constant 1.000000e+00 : f32
    %181 = vector.broadcast %cst_62 : f32 to vector<8x128xf32>
    %182 = arith.addf %181, %180 : vector<8x128xf32>
    %183 = arith.divf %181, %182 : vector<8x128xf32>
    %184 = vector.extract_strided_slice %165 {offsets = [0, 384], sizes = [8, 128], strides = [1, 1]} : vector<8x512xf32> to vector<8x128xf32>
    %185 = math.tanh %184 : vector<8x128xf32>
    %186 = arith.mulf %171, %152 : vector<8x128xf32>
    %187 = arith.mulf %177, %185 : vector<8x128xf32>
    %188 = arith.addf %186, %187 : vector<8x128xf32>
    %189 = math.tanh %188 : vector<8x128xf32>
    %190 = arith.mulf %183, %189 : vector<8x128xf32>
    %191 = arith.index_cast %c4_i32 : i32 to index
    %c0_63 = arith.constant 0 : index
    %c0_64 = arith.constant 0 : index
    %192 = vector.load %arg7[%191, %c0_63, %c0_64] : memref<8x8x128xf32, #tpu.memory_space<vmem>>, vector<1x8x128xf32>
    %193 = vector.shape_cast %192 : vector<1x8x128xf32> to vector<8x128xf32>
    %194 = vector.shape_cast %190 : vector<8x128xf32> to vector<1x8x128xf32>
    tpu.vector_store %arg7[%191, %c0_63, %c0_64], %194 {strides = array<i32>} : memref<8x8x128xf32, #tpu.memory_space<vmem>>, vector<1x8x128xf32>,
    %c5_i32 = arith.constant 5 : i32
    %195 = arith.truncf %190 : vector<8x128xf32> to vector<8x128xbf16>
    %c0_65 = arith.constant 0 : index
    %c0_66 = arith.constant 0 : index
    %196 = vector.load %arg3[%c0_65, %c0_66] : memref<128x512xbf16, #tpu.memory_space<vmem>>, vector<128x512xbf16>
    %cst_67 = arith.constant dense<0.000000e+00> : vector<8x512xf32>
    %197 = tpu.matmul %195, %196, %cst_67 {dimension_numbers = #tpu.dot_dimension_numbers<[1], [0], [0], [1], [0, 0, 1, 1], [], []>} : vector<8x128xbf16>, vector<128x512xbf16>, vector<8x512xf32> -> vector<8x512xf32>
    %198 = arith.index_cast %c5_i32 : i32 to index
    %c0_68 = arith.constant 0 : index
    %c0_69 = arith.constant 0 : index
    %199 = vector.load %arg12[%198, %c0_68, %c0_69] : memref<8x8x512xf32, #tpu.memory_space<vmem>>, vector<1x8x512xf32>
    %200 = vector.shape_cast %199 : vector<1x8x512xf32> to vector<8x512xf32>
    %201 = arith.addf %200, %197 : vector<8x512xf32>
    %202 = vector.extract_strided_slice %201 {offsets = [0, 0], sizes = [8, 128], strides = [1, 1]} : vector<8x512xf32> to vector<8x128xf32>
    %203 = arith.negf %202 : vector<8x128xf32>
    %204 = math.exp %203 : vector<8x128xf32>
    %cst_70 = arith.constant 1.000000e+00 : f32
    %205 = vector.broadcast %cst_70 : f32 to vector<8x128xf32>
    %206 = arith.addf %205, %204 : vector<8x128xf32>
    %207 = arith.divf %205, %206 : vector<8x128xf32>
    %208 = vector.extract_strided_slice %201 {offsets = [0, 128], sizes = [8, 128], strides = [1, 1]} : vector<8x512xf32> to vector<8x128xf32>
    %209 = arith.negf %208 : vector<8x128xf32>
    %210 = math.exp %209 : vector<8x128xf32>
    %cst_71 = arith.constant 1.000000e+00 : f32
    %211 = vector.broadcast %cst_71 : f32 to vector<8x128xf32>
    %212 = arith.addf %211, %210 : vector<8x128xf32>
    %213 = arith.divf %211, %212 : vector<8x128xf32>
    %214 = vector.extract_strided_slice %201 {offsets = [0, 256], sizes = [8, 128], strides = [1, 1]} : vector<8x512xf32> to vector<8x128xf32>
    %215 = arith.negf %214 : vector<8x128xf32>
    %216 = math.exp %215 : vector<8x128xf32>
    %cst_72 = arith.constant 1.000000e+00 : f32
    %217 = vector.broadcast %cst_72 : f32 to vector<8x128xf32>
    %218 = arith.addf %217, %216 : vector<8x128xf32>
    %219 = arith.divf %217, %218 : vector<8x128xf32>
    %220 = vector.extract_strided_slice %201 {offsets = [0, 384], sizes = [8, 128], strides = [1, 1]} : vector<8x512xf32> to vector<8x128xf32>
    %221 = math.tanh %220 : vector<8x128xf32>
    %222 = arith.mulf %207, %188 : vector<8x128xf32>
    %223 = arith.mulf %213, %221 : vector<8x128xf32>
    %224 = arith.addf %222, %223 : vector<8x128xf32>
    %225 = math.tanh %224 : vector<8x128xf32>
    %226 = arith.mulf %219, %225 : vector<8x128xf32>
    %227 = arith.index_cast %c5_i32 : i32 to index
    %c0_73 = arith.constant 0 : index
    %c0_74 = arith.constant 0 : index
    %228 = vector.load %arg7[%227, %c0_73, %c0_74] : memref<8x8x128xf32, #tpu.memory_space<vmem>>, vector<1x8x128xf32>
    %229 = vector.shape_cast %228 : vector<1x8x128xf32> to vector<8x128xf32>
    %230 = vector.shape_cast %226 : vector<8x128xf32> to vector<1x8x128xf32>
    tpu.vector_store %arg7[%227, %c0_73, %c0_74], %230 {strides = array<i32>} : memref<8x8x128xf32, #tpu.memory_space<vmem>>, vector<1x8x128xf32>,
    %c6_i32 = arith.constant 6 : i32
    %231 = arith.truncf %226 : vector<8x128xf32> to vector<8x128xbf16>
    %c0_75 = arith.constant 0 : index
    %c0_76 = arith.constant 0 : index
    %232 = vector.load %arg3[%c0_75, %c0_76] : memref<128x512xbf16, #tpu.memory_space<vmem>>, vector<128x512xbf16>
    %cst_77 = arith.constant dense<0.000000e+00> : vector<8x512xf32>
    %233 = tpu.matmul %231, %232, %cst_77 {dimension_numbers = #tpu.dot_dimension_numbers<[1], [0], [0], [1], [0, 0, 1, 1], [], []>} : vector<8x128xbf16>, vector<128x512xbf16>, vector<8x512xf32> -> vector<8x512xf32>
    %234 = arith.index_cast %c6_i32 : i32 to index
    %c0_78 = arith.constant 0 : index
    %c0_79 = arith.constant 0 : index
    %235 = vector.load %arg12[%234, %c0_78, %c0_79] : memref<8x8x512xf32, #tpu.memory_space<vmem>>, vector<1x8x512xf32>
    %236 = vector.shape_cast %235 : vector<1x8x512xf32> to vector<8x512xf32>
    %237 = arith.addf %236, %233 : vector<8x512xf32>
    %238 = vector.extract_strided_slice %237 {offsets = [0, 0], sizes = [8, 128], strides = [1, 1]} : vector<8x512xf32> to vector<8x128xf32>
    %239 = arith.negf %238 : vector<8x128xf32>
    %240 = math.exp %239 : vector<8x128xf32>
    %cst_80 = arith.constant 1.000000e+00 : f32
    %241 = vector.broadcast %cst_80 : f32 to vector<8x128xf32>
    %242 = arith.addf %241, %240 : vector<8x128xf32>
    %243 = arith.divf %241, %242 : vector<8x128xf32>
    %244 = vector.extract_strided_slice %237 {offsets = [0, 128], sizes = [8, 128], strides = [1, 1]} : vector<8x512xf32> to vector<8x128xf32>
    %245 = arith.negf %244 : vector<8x128xf32>
    %246 = math.exp %245 : vector<8x128xf32>
    %cst_81 = arith.constant 1.000000e+00 : f32
    %247 = vector.broadcast %cst_81 : f32 to vector<8x128xf32>
    %248 = arith.addf %247, %246 : vector<8x128xf32>
    %249 = arith.divf %247, %248 : vector<8x128xf32>
    %250 = vector.extract_strided_slice %237 {offsets = [0, 256], sizes = [8, 128], strides = [1, 1]} : vector<8x512xf32> to vector<8x128xf32>
    %251 = arith.negf %250 : vector<8x128xf32>
    %252 = math.exp %251 : vector<8x128xf32>
    %cst_82 = arith.constant 1.000000e+00 : f32
    %253 = vector.broadcast %cst_82 : f32 to vector<8x128xf32>
    %254 = arith.addf %253, %252 : vector<8x128xf32>
    %255 = arith.divf %253, %254 : vector<8x128xf32>
    %256 = vector.extract_strided_slice %237 {offsets = [0, 384], sizes = [8, 128], strides = [1, 1]} : vector<8x512xf32> to vector<8x128xf32>
    %257 = math.tanh %256 : vector<8x128xf32>
    %258 = arith.mulf %243, %224 : vector<8x128xf32>
    %259 = arith.mulf %249, %257 : vector<8x128xf32>
    %260 = arith.addf %258, %259 : vector<8x128xf32>
    %261 = math.tanh %260 : vector<8x128xf32>
    %262 = arith.mulf %255, %261 : vector<8x128xf32>
    %263 = arith.index_cast %c6_i32 : i32 to index
    %c0_83 = arith.constant 0 : index
    %c0_84 = arith.constant 0 : index
    %264 = vector.load %arg7[%263, %c0_83, %c0_84] : memref<8x8x128xf32, #tpu.memory_space<vmem>>, vector<1x8x128xf32>
    %265 = vector.shape_cast %264 : vector<1x8x128xf32> to vector<8x128xf32>
    %266 = vector.shape_cast %262 : vector<8x128xf32> to vector<1x8x128xf32>
    tpu.vector_store %arg7[%263, %c0_83, %c0_84], %266 {strides = array<i32>} : memref<8x8x128xf32, #tpu.memory_space<vmem>>, vector<1x8x128xf32>,
    %c7_i32 = arith.constant 7 : i32
    %267 = arith.truncf %262 : vector<8x128xf32> to vector<8x128xbf16>
    %c0_85 = arith.constant 0 : index
    %c0_86 = arith.constant 0 : index
    %268 = vector.load %arg3[%c0_85, %c0_86] : memref<128x512xbf16, #tpu.memory_space<vmem>>, vector<128x512xbf16>
    %cst_87 = arith.constant dense<0.000000e+00> : vector<8x512xf32>
    %269 = tpu.matmul %267, %268, %cst_87 {dimension_numbers = #tpu.dot_dimension_numbers<[1], [0], [0], [1], [0, 0, 1, 1], [], []>} : vector<8x128xbf16>, vector<128x512xbf16>, vector<8x512xf32> -> vector<8x512xf32>
    %270 = arith.index_cast %c7_i32 : i32 to index
    %c0_88 = arith.constant 0 : index
    %c0_89 = arith.constant 0 : index
    %271 = vector.load %arg12[%270, %c0_88, %c0_89] : memref<8x8x512xf32, #tpu.memory_space<vmem>>, vector<1x8x512xf32>
    %272 = vector.shape_cast %271 : vector<1x8x512xf32> to vector<8x512xf32>
    %273 = arith.addf %272, %269 : vector<8x512xf32>
    %274 = vector.extract_strided_slice %273 {offsets = [0, 0], sizes = [8, 128], strides = [1, 1]} : vector<8x512xf32> to vector<8x128xf32>
    %275 = arith.negf %274 : vector<8x128xf32>
    %276 = math.exp %275 : vector<8x128xf32>
    %cst_90 = arith.constant 1.000000e+00 : f32
    %277 = vector.broadcast %cst_90 : f32 to vector<8x128xf32>
    %278 = arith.addf %277, %276 : vector<8x128xf32>
    %279 = arith.divf %277, %278 : vector<8x128xf32>
    %280 = vector.extract_strided_slice %273 {offsets = [0, 128], sizes = [8, 128], strides = [1, 1]} : vector<8x512xf32> to vector<8x128xf32>
    %281 = arith.negf %280 : vector<8x128xf32>
    %282 = math.exp %281 : vector<8x128xf32>
    %cst_91 = arith.constant 1.000000e+00 : f32
    %283 = vector.broadcast %cst_91 : f32 to vector<8x128xf32>
    %284 = arith.addf %283, %282 : vector<8x128xf32>
    %285 = arith.divf %283, %284 : vector<8x128xf32>
    %286 = vector.extract_strided_slice %273 {offsets = [0, 256], sizes = [8, 128], strides = [1, 1]} : vector<8x512xf32> to vector<8x128xf32>
    %287 = arith.negf %286 : vector<8x128xf32>
    %288 = math.exp %287 : vector<8x128xf32>
    %cst_92 = arith.constant 1.000000e+00 : f32
    %289 = vector.broadcast %cst_92 : f32 to vector<8x128xf32>
    %290 = arith.addf %289, %288 : vector<8x128xf32>
    %291 = arith.divf %289, %290 : vector<8x128xf32>
    %292 = vector.extract_strided_slice %273 {offsets = [0, 384], sizes = [8, 128], strides = [1, 1]} : vector<8x512xf32> to vector<8x128xf32>
    %293 = math.tanh %292 : vector<8x128xf32>
    %294 = arith.mulf %279, %260 : vector<8x128xf32>
    %295 = arith.mulf %285, %293 : vector<8x128xf32>
    %296 = arith.addf %294, %295 : vector<8x128xf32>
    %297 = math.tanh %296 : vector<8x128xf32>
    %298 = arith.mulf %291, %297 : vector<8x128xf32>
    %299 = arith.index_cast %c7_i32 : i32 to index
    %c0_93 = arith.constant 0 : index
    %c0_94 = arith.constant 0 : index
    %300 = vector.load %arg7[%299, %c0_93, %c0_94] : memref<8x8x128xf32, #tpu.memory_space<vmem>>, vector<1x8x128xf32>
    %301 = vector.shape_cast %300 : vector<1x8x128xf32> to vector<8x128xf32>
    %302 = vector.shape_cast %298 : vector<8x128xf32> to vector<1x8x128xf32>
    tpu.vector_store %arg7[%299, %c0_93, %c0_94], %302 {strides = array<i32>} : memref<8x8x128xf32, #tpu.memory_space<vmem>>, vector<1x8x128xf32>,
    %c8_i32 = arith.constant 8 : i32
    %c0_95 = arith.constant 0 : index
    %c0_96 = arith.constant 0 : index
    %303 = vector.load %arg10[%c0_95, %c0_96] : memref<8x128xf32, #tpu.memory_space<vmem>>, vector<8x128xf32>
    tpu.vector_store %arg10[%c0_95, %c0_96], %298 {strides = array<i32>} : memref<8x128xf32, #tpu.memory_space<vmem>>, vector<8x128xf32>,
    %c0_97 = arith.constant 0 : index
    %c0_98 = arith.constant 0 : index
    %304 = vector.load %arg11[%c0_97, %c0_98] : memref<8x128xf32, #tpu.memory_space<vmem>>, vector<8x128xf32>
    tpu.vector_store %arg11[%c0_97, %c0_98], %296 {strides = array<i32>} : memref<8x128xf32, #tpu.memory_space<vmem>>, vector<8x128xf32>,
    %c0_i32_99 = arith.constant 0 : i32
    %305 = arith.cmpi eq, %arg0, %c0_i32_99 : i32
    %306 = arith.extui %305 : i1 to i32
    %c0_i32_100 = arith.constant 0 : i32
    %307 = arith.cmpi ne, %306, %c0_i32_100 : i32
    scf.if %307 {
      %c0_101 = arith.constant 0 : index
      %c0_102 = arith.constant 0 : index
      %308 = vector.load %arg8[%c0_101, %c0_102] : memref<8x128xf32, #tpu.memory_space<vmem>>, vector<8x128xf32>
      tpu.vector_store %arg8[%c0_101, %c0_102], %298 {strides = array<i32>} : memref<8x128xf32, #tpu.memory_space<vmem>>, vector<8x128xf32>,
      %c0_103 = arith.constant 0 : index
      %c0_104 = arith.constant 0 : index
      %309 = vector.load %arg9[%c0_103, %c0_104] : memref<8x128xf32, #tpu.memory_space<vmem>>, vector<8x128xf32>
      tpu.vector_store %arg9[%c0_103, %c0_104], %296 {strides = array<i32>} : memref<8x128xf32, #tpu.memory_space<vmem>>, vector<8x128xf32>,
    } else {
    }
    return
  }
  func.func @transform_0(%arg0: i32) -> (i32, i32, i32) {
    %c0_i32 = arith.constant 0 : i32
    %c0_i32_0 = arith.constant 0 : i32
    %c0_i32_1 = arith.constant 0 : i32
    return %arg0, %c0_i32, %c0_i32_0 : i32, i32, i32
  }
  func.func @transform_1(%arg0: i32) -> (i32, i32) {
    %c0_i32 = arith.constant 0 : i32
    %c0_i32_0 = arith.constant 0 : i32
    %c0_i32_1 = arith.constant 0 : i32
    return %c0_i32, %c0_i32_0 : i32, i32
  }
  func.func @transform_2(%arg0: i32) -> (i32, i32) {
    %c0_i32 = arith.constant 0 : i32
    %c0_i32_0 = arith.constant 0 : i32
    %c0_i32_1 = arith.constant 0 : i32
    return %c0_i32, %c0_i32_0 : i32, i32
  }
  func.func @transform_3(%arg0: i32) -> (i32, i32) {
    %c0_i32 = arith.constant 0 : i32
    %c0_i32_0 = arith.constant 0 : i32
    %c0_i32_1 = arith.constant 0 : i32
    return %c0_i32, %c0_i32_0 : i32, i32
  }
  func.func @transform_4(%arg0: i32) -> (i32, i32) {
    %c0_i32 = arith.constant 0 : i32
    %c0_i32_0 = arith.constant 0 : i32
    %c0_i32_1 = arith.constant 0 : i32
    return %c0_i32, %c0_i32_0 : i32, i32
  }
  func.func @transform_5(%arg0: i32) -> (i32, i32) {
    %c0_i32 = arith.constant 0 : i32
    %c0_i32_0 = arith.constant 0 : i32
    %c0_i32_1 = arith.constant 0 : i32
    return %c0_i32, %c0_i32_0 : i32, i32
  }
  func.func @transform_6(%arg0: i32) -> (i32, i32, i32) {
    %c0_i32 = arith.constant 0 : i32
    %c0_i32_0 = arith.constant 0 : i32
    %c0_i32_1 = arith.constant 0 : i32
    return %arg0, %c0_i32, %c0_i32_0 : i32, i32, i32
  }
  func.func @transform_7(%arg0: i32) -> (i32, i32) {
    %c0_i32 = arith.constant 0 : i32
    %c0_i32_0 = arith.constant 0 : i32
    %c0_i32_1 = arith.constant 0 : i32
    return %c0_i32, %c0_i32_0 : i32, i32
  }
  func.func @transform_8(%arg0: i32) -> (i32, i32) {
    %c0_i32 = arith.constant 0 : i32
    %c0_i32_0 = arith.constant 0 : i32
    %c0_i32_1 = arith.constant 0 : i32
    return %c0_i32, %c0_i32_0 : i32, i32
  }
}

</mosaic_0001>

<bundles_post_ra>
// kernel: tpu_custom_call.1
= control target key start
LH: loop header
LB: loop body
LE: loop exit
PB: predicated region body
PF: predicated region fallthrough
CT: control target
= control target key end

     0   :  { %14 = vsyncpa [#allocation6], 0  ;;  %s4502_s0 = inlined_call_operand.hbm [shape: f32[8,8,128], index: 0, kind: input, shape index: {}]   ;;  %s4503_s1 = inlined_call_operand.hbm [shape: bf16[128,512], index: 1, kind: input, shape index: {}]   ;;  %s4504_s2 = inlined_call_operand.hbm [shape: bf16[128,512], index: 2, kind: input, shape index: {}]   ;;  %s4505_s3 = inlined_call_operand.hbm [shape: f32[1,512], index: 3, kind: input, shape index: {}]   ;;  %s4506_s4 = inlined_call_operand.vmem [shape: f32[8,128], index: 4, kind: input, shape index: {}]   ;;  %s4507_s5 = inlined_call_operand.vmem [shape: f32[8,128], index: 5, kind: input, shape index: {}]   ;;  %s4508_s6 = inlined_call_operand.hbm [shape: f32[8,8,128], index: 6, kind: output, shape index: {0}]   ;;  %s4509_s7 = inlined_call_operand.hbm [shape: f32[8,128], index: 7, kind: output, shape index: {1}]   ;;  %s4510_s8 = inlined_call_operand.hbm [shape: f32[8,128], index: 8, kind: output, shape index: {2}]  }
   0x1   :  { %15 = vsyncpa [#allocation9], 0 }
   0x2   :  { %16 = vsyncpa [#allocation12], 0 }
   0x3   :  { %17 = vsyncpa [#allocation7], 0 }
   0x4   :  { %18 = vsyncpa [#allocation15], 0  ;;  %s3787_s27 = smov [#allocation8]   ;;  %s3623_s9 = scalar_lea.hbm %s4503_s1, 4096 }
   0x5   :  { %s36_s28 = sshll.u32 %s3787_s27, 4  ;;  %p3624_p0 = scmp.ne.s32.totalorder %s4503_s1, %s3623_s9  ;;  %s37_s28 = int_to_ptr.vmem [resolvable:$true] %s36_s28 }
   0x6   :  { %p3627_p1 = scmp.lt.u32.totalorder %s3623_s9, %s4503_s1 }
   0x8   :  { %p3629_p2 = pnand %p3627_p1, %p3624_p0 }
   0xa   :  { %3632 = shalt.err (!%p3629_p2)
}
   0xb   :  { %s3633_s14 = scalar_lea.vmem %s37_s28, 4096  ;;  %p3638_p4 = scmp.lt.s32.totalorder %s37_s28, %s37_s28 }
   0xc   :  { %p3634_p3 = scmp.ne.s32.totalorder %s37_s28, %s3633_s14  ;;  %p3639_p5 = scmp.lt.s32.totalorder %s3633_s14, %s3633_s14 }
   0xe   :  { %p3640_p6 = por %p3639_p5, %p3638_p4 }
  0x10   :  { %p3641_p7 = pnand %p3640_p6, %p3634_p3 }
  0x12   :  { %3644 = shalt.err (!%p3641_p7)
}
  0x13   :  { %s3788_s15 = smov 256   ;;  %s3789_s16 = smov 16  }
  0x14   :  { %42 = dma.hbm_to_vmem [thread:$0]  %s4503_s1, 4096, %s37_s28, [#allocation9], %s3788_s15, %s3788_s15, %s3789_s16  }
  0x15   :  { %s3790_s19 = smov [#allocation5]   ;;  %s3645_s23 = scalar_lea.hbm %s4502_s0, 1024 }
  0x16   :  { %s24_s20 = sshll.u32 %s3790_s19, 4  ;;  %p3646_p8 = scmp.ne.s32.totalorder %s4502_s0, %s3645_s23  ;;  %s25_s20 = int_to_ptr.vmem [resolvable:$true] %s24_s20 }
  0x17   :  { %p3649_p9 = scmp.lt.u32.totalorder %s3645_s23, %s4502_s0 }
  0x19   :  { %p3651_p10 = pnand %p3649_p9, %p3646_p8 }
  0x1b   :  { %3654 = shalt.err (!%p3651_p10)
}
  0x1c   :  { %s3655_s29 = scalar_lea.vmem %s25_s20, 1024  ;;  %p3660_p12 = scmp.lt.s32.totalorder %s25_s20, %s25_s20 }
  0x1d   :  { %p3656_p11 = scmp.ne.s32.totalorder %s25_s20, %s3655_s29  ;;  %p3661_p13 = scmp.lt.s32.totalorder %s3655_s29, %s3655_s29 }
  0x1f   :  { %p3662_p0 = por %p3661_p13, %p3660_p12 }
  0x21   :  { %p3663_p1 = pnand %p3662_p0, %p3656_p11 }
  0x23   :  { %3666 = shalt.err (!%p3663_p1)
}
  0x24   :  { %s3791_s1 = smov 128   ;;  %s3792_s28 = smov 8  }
  0x25   :  { %30 = dma.hbm_to_vmem [thread:$0]  %s4502_s0, 1024, %s25_s20, [#allocation6], %s3791_s1, %s3791_s1, %s3792_s28  }
  0x26   :  { %s3793_s10 = smov [#allocation10]   ;;  %s3794_s12 = smov [#allocation11]  }
  0x27   :  { %s48_s11 = sshll.u32 %s3793_s10, 4  ;;  %s61_s13 = sshll.u32 %s3794_s12, 4  ;;  %s49_s11 = int_to_ptr.vmem [resolvable:$true] %s48_s11  ;;  %s62_s13 = int_to_ptr.vmem [resolvable:$true] %s61_s13 }
  0x28   :  { %s3667_s18 = scalar_lea.hbm %s4504_s2, 4096 }
  0x29   :  { %p3668_p2 = scmp.ne.s32.totalorder %s4504_s2, %s3667_s18  ;;  %p3671_p3 = scmp.lt.u32.totalorder %s3667_s18, %s4504_s2 }
  0x2b   :  { %p3673_p4 = pnand %p3671_p3, %p3668_p2 }
  0x2d   :  { %3676 = shalt.err (!%p3673_p4)
}
  0x2e   :  { %s3677_s0 = scalar_lea.vmem %s49_s11, 4096  ;;  %p3682_p6 = scmp.lt.s32.totalorder %s49_s11, %s49_s11 }
  0x2f   :  { %p3678_p5 = scmp.ne.s32.totalorder %s49_s11, %s3677_s0  ;;  %p3683_p7 = scmp.lt.s32.totalorder %s3677_s0, %s3677_s0 }
  0x31   :  { %p3684_p8 = por %p3683_p7, %p3682_p6 }
  0x33   :  { %p3685_p9 = pnand %p3684_p8, %p3678_p5 }
  0x35   :  { %3688 = shalt.err (!%p3685_p9)
}
  0x36   :  { %54 = dma.hbm_to_vmem [thread:$0]  %s4504_s2, 4096, %s49_s11, [#allocation9], %s3788_s15, %s3788_s15, %s3789_s16  }
  0x37   :  { %s3689_s27 = scalar_lea.hbm %s4505_s3, 64 }
  0x38   :  { %p3690_p10 = scmp.ne.s32.totalorder %s4505_s3, %s3689_s27  ;;  %p3693_p11 = scmp.lt.u32.totalorder %s3689_s27, %s4505_s3 }
  0x3a   :  { %p3695_p12 = pnand %p3693_p11, %p3690_p10 }
  0x3c   :  { %3698 = shalt.err (!%p3695_p12)
}
  0x3d   :  { %s3699_s12 = scalar_lea.vmem %s62_s13, 64  ;;  %p3704_p0 = scmp.lt.s32.totalorder %s62_s13, %s62_s13 }
  0x3e   :  { %p3700_p13 = scmp.ne.s32.totalorder %s62_s13, %s3699_s12  ;;  %p3705_p1 = scmp.lt.s32.totalorder %s3699_s12, %s3699_s12 }
  0x40   :  { %p3706_p2 = por %p3705_p1, %p3704_p0 }
  0x42   :  { %p3707_p3 = pnand %p3706_p2, %p3700_p13 }
  0x44   :  { %3710 = shalt.err (!%p3707_p3)
}
  0x45   :  { %64 = dma.hbm_to_vmem [thread:$0]  %s4505_s3, 64, %s62_s13, [#allocation12]  }
  0x46   :  { %3777 = dma.done.wait [#allocation6], 1024  }
  0x47   :  { %3778 = vsyncadd [#allocation6], 4294966272 }
  0x48   :  { %3779 = dma.done.wait [#allocation9], 8192  }
  0x49   :  { %3780 = vsyncadd [#allocation9], 4294959104 }
  0x4a   :  { %3781 = dma.done.wait [#allocation12], 64  }
  0x4b   :  { %3782 = vsyncadd [#allocation12], 4294967232  ;;  %v4511_v0 = vmov 0   ;;  %v3351_v1 = vld [vmem:[#allocation8 + $0x4] ss:$16 sps:$4 sm:$0xff]   ;;  %v91_v34 = vld [vmem:[#allocation5 + $0x8] sm:$0xff] }
  0x4c   :  { %348 = vmatprep.mubr.bf16.mxu0 %v4511_v0  ;;  %421 = vmatprep.mubr.bf16.mxu1 %v4511_v0  ;;  %v3353_v2 = vld [vmem:[#allocation8 + $0xc] ss:$16 sps:$4 sm:$0xff]   ;;  %v3355_v3 = vld [vmem:[#allocation8] ss:$16 sps:$4 sm:$0xff]   ;;  %v3356_v4 = vld [vmem:[#allocation8 + $0x8] ss:$16 sps:$4 sm:$0xff]  }
  0x4d   :  { %316 = vmatprep.subr.bf16.mxu0 %v3351_v1  ;;  %389 = vmatprep.subr.bf16.mxu1 %v3353_v2  ;;  %v3357_v5 = vld [vmem:[#allocation8 + $0x24] ss:$16 sps:$4 sm:$0xff]   ;;  %v3359_v6 = vld [vmem:[#allocation8 + $0x2c] ss:$16 sps:$4 sm:$0xff]   ;;  %v3361_v7 = vld [vmem:[#allocation8 + $0x20] ss:$16 sps:$4 sm:$0xff]  }
  0x4e   :  { %317 = vmatpush1.bf16.msra.mxu0 %v3355_v3  ;;  %390 = vmatpush1.bf16.msra.mxu1 %v3356_v4  ;;  %v3362_v8 = vld [vmem:[#allocation8 + $0x28] ss:$16 sps:$4 sm:$0xff]   ;;  %v3363_v9 = vld [vmem:[#allocation8 + $0x44] ss:$16 sps:$4 sm:$0xff]   ;;  %v3365_v10 = vld [vmem:[#allocation8 + $0x4c] ss:$16 sps:$4 sm:$0xff]  }
  0x4f   :  { %318 = vmatprep.subr.bf16.mxu0 %v3357_v5  ;;  %391 = vmatprep.subr.bf16.mxu1 %v3359_v6  ;;  %v3367_v11 = vld [vmem:[#allocation8 + $0x40] ss:$16 sps:$4 sm:$0xff]   ;;  %v3368_v12 = vld [vmem:[#allocation8 + $0x48] ss:$16 sps:$4 sm:$0xff]   ;;  %v3369_v13 = vld [vmem:[#allocation8 + $0x64] ss:$16 sps:$4 sm:$0xff]  }
  0x50   :  { %v3371_v14 = vld [vmem:[#allocation8 + $0x6c] ss:$16 sps:$4 sm:$0xff]   ;;  %v3373_v15 = vld [vmem:[#allocation8 + $0x60] ss:$16 sps:$4 sm:$0xff]   ;;  %v3374_v16 = vld [vmem:[#allocation8 + $0x68] ss:$16 sps:$4 sm:$0xff]  }
  0x51   :  { %v3375_v17 = vld [vmem:[#allocation8 + $0x84] ss:$16 sps:$4 sm:$0xff]   ;;  %v3377_v18 = vld [vmem:[#allocation8 + $0x8c] ss:$16 sps:$4 sm:$0xff]   ;;  %v3379_v19 = vld [vmem:[#allocation8 + $0x80] ss:$16 sps:$4 sm:$0xff]  }
  0x52   :  { %319 = vmatpush1.bf16.msra.mxu0 %v3361_v7  ;;  %392 = vmatpush1.bf16.msra.mxu1 %v3362_v8  ;;  %v3380_v20 = vld [vmem:[#allocation8 + $0x88] ss:$16 sps:$4 sm:$0xff]   ;;  %v3381_v21 = vld [vmem:[#allocation8 + $0xa4] ss:$16 sps:$4 sm:$0xff]   ;;  %v3383_v22 = vld [vmem:[#allocation8 + $0xac] ss:$16 sps:$4 sm:$0xff]  }
  0x53   :  { %320 = vmatprep.subr.bf16.mxu0 %v3363_v9  ;;  %393 = vmatprep.subr.bf16.mxu1 %v3365_v10  ;;  %v3385_v23 = vld [vmem:[#allocation8 + $0xa0] ss:$16 sps:$4 sm:$0xff]   ;;  %v3386_v24 = vld [vmem:[#allocation8 + $0xa8] ss:$16 sps:$4 sm:$0xff]   ;;  %v3387_v25 = vld [vmem:[#allocation8 + $0xc4] ss:$16 sps:$4 sm:$0xff]  }
  0x54   :  { %v3389_v26 = vld [vmem:[#allocation8 + $0xcc] ss:$16 sps:$4 sm:$0xff]   ;;  %v3391_v27 = vld [vmem:[#allocation8 + $0xc0] ss:$16 sps:$4 sm:$0xff]   ;;  %v3392_v28 = vld [vmem:[#allocation8 + $0xc8] ss:$16 sps:$4 sm:$0xff]  }
  0x55   :  { %v3393_v29 = vld [vmem:[#allocation8 + $0xe4] ss:$16 sps:$4 sm:$0xff]   ;;  %v3395_v30 = vld [vmem:[#allocation8 + $0xec] ss:$16 sps:$4 sm:$0xff]   ;;  %v3397_v31 = vld [vmem:[#allocation8 + $0xe0] ss:$16 sps:$4 sm:$0xff]  }
  0x56   :  { %321 = vmatpush1.bf16.msra.mxu0 %v3367_v11  ;;  %394 = vmatpush1.bf16.msra.mxu1 %v3368_v12  ;;  %v3398_v32 = vld [vmem:[#allocation8 + $0xe8] ss:$16 sps:$4 sm:$0xff]   ;;  %v90_v33 = vld [vmem:[#allocation5] sm:$0xff]  ;;  %v3905_v36 = vld [vmem:[#allocation10 + $0xc] ss:$16 sps:$4 sm:$0xff]   ;;  %s3797_s14 = smov [#allocation13]  }
  0x57   :  { %322 = vmatprep.subr.bf16.mxu0 %v3369_v13  ;;  %395 = vmatprep.subr.bf16.mxu1 %v3371_v14  ;;  %v3903_v35 = vld [vmem:[#allocation10 + $0x4] ss:$16 sps:$4 sm:$0xff]   ;;  %v98_v37 = vpack.c.bf16 %v91_v34, %v90_v33  ;;  %v3907_v38 = vld [vmem:[#allocation10] ss:$16 sps:$4 sm:$0xff]   ;;  %v3909_v39 = vld [vmem:[#allocation10 + $0x8] ss:$16 sps:$4 sm:$0xff]  }
  0x58   :  { %v3913_v40 = vld [vmem:[#allocation10 + $0x24] ss:$16 sps:$4 sm:$0xff]   ;;  %v3915_v41 = vld [vmem:[#allocation10 + $0x2c] ss:$16 sps:$4 sm:$0xff]   ;;  %v3917_v42 = vld [vmem:[#allocation10 + $0x20] ss:$16 sps:$4 sm:$0xff]  }
  0x59   :  { %v3919_v43 = vld [vmem:[#allocation10 + $0x28] ss:$16 sps:$4 sm:$0xff]   ;;  %v92_v44 = vld [vmem:[#allocation5 + $0x10] sm:$0xff]  ;;  %v3927_v47 = vld [vmem:[#allocation10 + $0x4c] ss:$16 sps:$4 sm:$0xff]   ;;  %s2986_s17 = sshll.u32 %s3797_s14, 4  ;;  %s4449_s17 = int_to_ptr.vmem [resolvable:$true] %s2986_s17 }
  0x5a   :  { %323 = vmatpush1.bf16.msra.mxu0 %v3373_v15  ;;  %396 = vmatpush1.bf16.msra.mxu1 %v3374_v16  ;;  %v93_v45 = vld [vmem:[#allocation5 + $0x18] sm:$0xff]  ;;  %v3925_v46 = vld [vmem:[#allocation10 + $0x44] ss:$16 sps:$4 sm:$0xff]   ;;  %v3931_v49 = vld [vmem:[#allocation10 + $0x40] ss:$16 sps:$4 sm:$0xff]   ;;  %v136_v16 = vlaneseq  ;;  %s3798_s18 = smov [#allocation16]  }
  0x5b   :  { %324 = vmatprep.subr.bf16.mxu0 %v3375_v17  ;;  %397 = vmatprep.subr.bf16.mxu1 %v3377_v18  ;;  %v99_v48 = vpack.c.bf16 %v93_v45, %v92_v44  ;;  %v3933_v50 = vld [vmem:[#allocation10 + $0x48] ss:$16 sps:$4 sm:$0xff]   ;;  %v3937_v51 = vld [vmem:[#allocation10 + $0x64] ss:$16 sps:$4 sm:$0xff]   ;;  %v3941_v52 = vld [vmem:[#allocation10 + $0x6c] ss:$16 sps:$4 sm:$0xff]  }
  0x5c   :  { %v3943_v53 = vld [vmem:[#allocation10 + $0x60] ss:$16 sps:$4 sm:$0xff]   ;;  %v3945_v54 = vld [vmem:[#allocation10 + $0x68] ss:$16 sps:$4 sm:$0xff]   ;;  %v3951_v57 = vld [vmem:[#allocation10 + $0x84] ss:$16 sps:$4 sm:$0xff]  }
  0x5d   :  { %v94_v55 = vld [vmem:[#allocation5 + $0x20] sm:$0xff]  ;;  %v95_v56 = vld [vmem:[#allocation5 + $0x28] sm:$0xff]  ;;  %v96_v3 = vld [vmem:[#allocation5 + $0x30] sm:$0xff]  ;;  %v137_v17 = vshrl.u32 %v136_v16, 7  ;;  %s3009_s19 = sshll.u32 %s3798_s18, 4  ;;  %s4451_s19 = int_to_ptr.vmem [resolvable:$true] %s3009_s19 }
  0x5e   :  { %325 = vmatpush1.bf16.msra.mxu0 %v3379_v19  ;;  %398 = vmatpush1.bf16.msra.mxu1 %v3380_v20  ;;  %v3953_v58 = vld [vmem:[#allocation10 + $0x8c] ss:$16 sps:$4 sm:$0xff]   ;;  %v3957_v59 = vld [vmem:[#allocation10 + $0x80] ss:$16 sps:$4 sm:$0xff]   ;;  %v3959_v60 = vld [vmem:[#allocation10 + $0x88] ss:$16 sps:$4 sm:$0xff]   ;;  %v100_v61 = vpack.c.bf16 %v95_v56, %v94_v55 }
  0x5f   :  { %326 = vmatprep.subr.bf16.mxu0 %v3381_v21  ;;  %399 = vmatprep.subr.bf16.mxu1 %v3383_v22  ;;  %v3961_v62 = vld [vmem:[#allocation10 + $0xa4] ss:$16 sps:$4 sm:$0xff]   ;;  %v3963_v63 = vld [vmem:[#allocation10 + $0xac] ss:$16 sps:$4 sm:$0xff]   ;;  %v3969_v1 = vld [vmem:[#allocation10 + $0xa0] ss:$16 sps:$4 sm:$0xff]  }
  0x60   :  { %v3971_v2 = vld [vmem:[#allocation10 + $0xa8] ss:$16 sps:$4 sm:$0xff]   ;;  %v3973_v5 = vld [vmem:[#allocation10 + $0xc4] ss:$16 sps:$4 sm:$0xff]   ;;  %v3975_v6 = vld [vmem:[#allocation10 + $0xcc] ss:$16 sps:$4 sm:$0xff]  }
  0x61   :  { %v97_v4 = vld [vmem:[#allocation5 + $0x38] sm:$0xff]  ;;  %v3983_v7 = vld [vmem:[#allocation10 + $0xc0] ss:$16 sps:$4 sm:$0xff]   ;;  %v3991_v10 = vld [vmem:[#allocation10 + $0xe4] ss:$16 sps:$4 sm:$0xff]   ;;  %v146_v18 = vsub.s32 2, %v137_v17 }
  0x62   :  { %327 = vmatpush1.bf16.msra.mxu0 %v3385_v23  ;;  %400 = vmatpush1.bf16.msra.mxu1 %v3386_v24  ;;  %v101_v8 = vpack.c.bf16 %v97_v4, %v96_v3  ;;  %v3987_v9 = vld [vmem:[#allocation10 + $0xc8] ss:$16 sps:$4 sm:$0xff]   ;;  %v3993_v11 = vld [vmem:[#allocation10 + $0xec] ss:$16 sps:$4 sm:$0xff]   ;;  %v3997_v12 = vld [vmem:[#allocation10 + $0xe0] ss:$16 sps:$4 sm:$0xff]  }
  0x63   :  { %328 = vmatprep.subr.bf16.mxu0 %v3387_v25  ;;  %401 = vmatprep.subr.bf16.mxu1 %v3389_v26  ;;  %v3999_v13 = vld [vmem:[#allocation10 + $0xe8] ss:$16 sps:$4 sm:$0xff]   ;;  %v86_v14 = vld [vmem:[%s4506_s4] sm:$0xff]  ;;  %v150_v19 = vsub.s32 3, %v137_v17  ;;  %v138_v20 = vsub.s32 0, %v137_v17  ;;  %v142_v22 = vsub.s32 1, %v137_v17 }
  0x64   :  { %v496_v15 = vpack.c.bf16 %v86_v14, %v86_v14  ;;  %v134_v21 = vld [vmem:[#allocation11] sm:$0xf] }
  0x65   :  { %v4046_v23 = vrot.slane %v134_v21, %v146_v18  ;;  %v4052_v26 = vrot.slane %v134_v21, %v150_v19 }
  0x66   :  { %329 = vmatpush1.bf16.msra.mxu0 %v3391_v27  ;;  %402 = vmatpush1.bf16.msra.mxu1 %v3392_v28  ;;  %v139_v27 = vrot.slane %v134_v21, %v138_v20 }
  0x67   :  { %330 = vmatprep.subr.bf16.mxu0 %v3393_v29  ;;  %403 = vmatprep.subr.bf16.mxu1 %v3395_v30  ;;  %v143_v30 = vrot.slane %v134_v21, %v142_v22 }
  0x6a   :  { %331 = vmatpush1.bf16.msra.mxu0 %v3397_v31  ;;  %404 = vmatpush1.bf16.msra.mxu1 %v3398_v32 }
  0x6b   :  { %689 = vmatprep.subr.bf16.mxu0 %v3903_v35  ;;  %730 = vmatprep.subr.bf16.mxu1 %v3905_v36 }
  0x6d   :  { %349 = vmatmul.mubr.bf16.vlgmr.msra.gmra.mrb[0].mxu0 %v98_v37  ;;  %422 = vmatmul.mubr.bf16.vlgmr.msra.gmra.mrb[0].mxu1 %v98_v37 }
  0x6e   :  { %690 = vmatpush1.bf16.msra.mxu0 %v3907_v38  ;;  %731 = vmatpush1.bf16.msra.mxu1 %v3909_v39 }
  0x6f   :  { %691 = vmatprep.subr.bf16.mxu0 %v3913_v40  ;;  %732 = vmatprep.subr.bf16.mxu1 %v3915_v41 }
  0x70   :  { %358 = vmatprep.mubr.bf16.mxu0 %v4511_v0  ;;  %431 = vmatprep.mubr.bf16.mxu1 %v4511_v0 }
  0x72   :  { %692 = vmatpush1.bf16.msra.mxu0 %v3917_v42  ;;  %733 = vmatpush1.bf16.msra.mxu1 %v3919_v43 }
  0x73   :  { %693 = vmatprep.subr.bf16.mxu0 %v3925_v46  ;;  %734 = vmatprep.subr.bf16.mxu1 %v3927_v47 }
  0x75   :  { %359 = vmatmul.mubr.bf16.gmra.mrb[4].mxu0 %v99_v48  ;;  %432 = vmatmul.mubr.bf16.gmra.mrb[4].mxu1 %v99_v48 }
  0x76   :  { %694 = vmatpush1.bf16.msra.mxu0 %v3931_v49  ;;  %735 = vmatpush1.bf16.msra.mxu1 %v3933_v50 }
  0x77   :  { %695 = vmatprep.subr.bf16.mxu0 %v3937_v51  ;;  %736 = vmatprep.subr.bf16.mxu1 %v3941_v52 }
  0x78   :  { %368 = vmatprep.mubr.bf16.mxu0 %v4511_v0  ;;  %441 = vmatprep.mubr.bf16.mxu1 %v4511_v0 }
  0x7a   :  { %696 = vmatpush1.bf16.msra.mxu0 %v3943_v53  ;;  %737 = vmatpush1.bf16.msra.mxu1 %v3945_v54 }
  0x7b   :  { %697 = vmatprep.subr.bf16.mxu0 %v3951_v57  ;;  %738 = vmatprep.subr.bf16.mxu1 %v3953_v58 }
  0x7d   :  { %369 = vmatmul.mubr.bf16.gmra.mrb[8].mxu0 %v100_v61  ;;  %442 = vmatmul.mubr.bf16.gmra.mrb[8].mxu1 %v100_v61 }
  0x7e   :  { %698 = vmatpush1.bf16.msra.mxu0 %v3957_v59  ;;  %739 = vmatpush1.bf16.msra.mxu1 %v3959_v60 }
  0x7f   :  { %699 = vmatprep.subr.bf16.mxu0 %v3961_v62  ;;  %740 = vmatprep.subr.bf16.mxu1 %v3963_v63 }
  0x80   :  { %378 = vmatprep.mubr.bf16.mxu0 %v4511_v0  ;;  %451 = vmatprep.mubr.bf16.mxu1 %v4511_v0 }
  0x82   :  { %700 = vmatpush1.bf16.msra.mxu0 %v3969_v1  ;;  %741 = vmatpush1.bf16.msra.mxu1 %v3971_v2 }
  0x83   :  { %701 = vmatprep.subr.bf16.mxu0 %v3973_v5  ;;  %742 = vmatprep.subr.bf16.mxu1 %v3975_v6 }
  0x85   :  { %379 = vmatmul.mubr.bf16.gmra.mrb[12].mxu0 %v101_v8  ;;  %452 = vmatmul.mubr.bf16.gmra.mrb[12].mxu1 %v101_v8 }
  0x86   :  { %702 = vmatpush1.bf16.msra.mxu0 %v3983_v7  ;;  %743 = vmatpush1.bf16.msra.mxu1 %v3987_v9 }
  0x87   :  { %703 = vmatprep.subr.bf16.mxu0 %v3991_v10  ;;  %744 = vmatprep.subr.bf16.mxu1 %v3993_v11 }
  0x88   :  { %721 = vmatprep.mubr.bf16.mxu0 %v4511_v0  ;;  %762 = vmatprep.mubr.bf16.mxu1 %v4511_v0 }
  0x8a   :  { %704 = vmatpush1.bf16.msra.mxu0 %v3997_v12  ;;  %745 = vmatpush1.bf16.msra.mxu1 %v3999_v13 }
  0x8b   :  { %997 = vmatprep.subr.bf16.mxu0 %v3903_v35  ;;  %1038 = vmatprep.subr.bf16.mxu1 %v3905_v36 }
  0x8d   :  { %722 = vmatmul.mubr.bf16.vlgmr.msra.gmra.mrb[16].mxu0 %v496_v15  ;;  %763 = vmatmul.mubr.bf16.vlgmr.msra.gmra.mrb[16].mxu1 %v496_v15 }
  0x8e   :  { %998 = vmatpush1.bf16.msra.mxu0 %v3907_v38  ;;  %1039 = vmatpush1.bf16.msra.mxu1 %v3909_v39 }
  0x8f   :  { %999 = vmatprep.subr.bf16.mxu0 %v3913_v40  ;;  %1040 = vmatprep.subr.bf16.mxu1 %v3915_v41 }
  0x90   :  { %1029 = vmatprep.mubr.bf16.mxu0 %v4511_v0  ;;  %1070 = vmatprep.mubr.bf16.mxu1 %v4511_v0 }
  0x92   :  { %1000 = vmatpush1.bf16.msra.mxu0 %v3917_v42  ;;  %1041 = vmatpush1.bf16.msra.mxu1 %v3919_v43 }
  0x93   :  { %1001 = vmatprep.subr.bf16.mxu0 %v3925_v46  ;;  %1042 = vmatprep.subr.bf16.mxu1 %v3927_v47 }
  0x96   :  { %1002 = vmatpush1.bf16.msra.mxu0 %v3931_v49  ;;  %1043 = vmatpush1.bf16.msra.mxu1 %v3933_v50 }
  0x97   :  { %1003 = vmatprep.subr.bf16.mxu0 %v3937_v51  ;;  %1044 = vmatprep.subr.bf16.mxu1 %v3941_v52 }
  0x9a   :  { %1004 = vmatpush1.bf16.msra.mxu0 %v3943_v53  ;;  %1045 = vmatpush1.bf16.msra.mxu1 %v3945_v54 }
  0x9b   :  { %1005 = vmatprep.subr.bf16.mxu0 %v3951_v57  ;;  %1046 = vmatprep.subr.bf16.mxu1 %v3953_v58 }
  0x9e   :  { %1006 = vmatpush1.bf16.msra.mxu0 %v3957_v59  ;;  %1047 = vmatpush1.bf16.msra.mxu1 %v3959_v60 }
  0x9f   :  { %1007 = vmatprep.subr.bf16.mxu0 %v3961_v62  ;;  %1048 = vmatprep.subr.bf16.mxu1 %v3963_v63 }
  0xa2   :  { %1008 = vmatpush1.bf16.msra.mxu0 %v3969_v1  ;;  %1049 = vmatpush1.bf16.msra.mxu1 %v3971_v2 }
  0xa3   :  { %1009 = vmatprep.subr.bf16.mxu0 %v3973_v5  ;;  %1050 = vmatprep.subr.bf16.mxu1 %v3975_v6 }
  0xa6   :  { %1010 = vmatpush1.bf16.msra.mxu0 %v3983_v7  ;;  %1051 = vmatpush1.bf16.msra.mxu1 %v3987_v9 }
  0xa7   :  { %1011 = vmatprep.subr.bf16.mxu0 %v3991_v10  ;;  %1052 = vmatprep.subr.bf16.mxu1 %v3993_v11 }
  0xaa   :  { %1012 = vmatpush1.bf16.msra.mxu0 %v3997_v12  ;;  %1053 = vmatpush1.bf16.msra.mxu1 %v3999_v13 }
  0xab   :  { %1307 = vmatprep.subr.bf16.mxu0 %v3903_v35  ;;  %1348 = vmatprep.subr.bf16.mxu1 %v3905_v36 }
 0x140   :  { %v4048_v24 = vpop.f32.mrb[0].mxu0  ;;  %v4050_v25 = vpop.f32.mrb[0].mxu1 }
 0x141   :  { %v352_v28 = vpop.f32.mrb[1].mxu0  ;;  %v425_v29 = vpop.f32.mrb[1].mxu1 }
 0x142   :  { %v354_v31 = vpop.f32.mrb[2].mxu0  ;;  %v427_v32 = vpop.f32.mrb[2].mxu1 }
 0x143   :  { %v4054_v33 = vadd.f32 %v354_v31, %v139_v27  ;;  %v356_v34 = vpop.f32.mrb[3].mxu0  ;;  %v4057_v37 = vadd.f32 %v427_v32, %v4046_v23  ;;  %v429_v44 = vpop.f32.mrb[3].mxu1 }
 0x144   :  { %v4059_v45 = vadd.f32 %v356_v34, %v143_v30  ;;  %v4062_v48 = vadd.f32 %v429_v44, %v4052_v26 }
 0x148   :  { %v360_v55 = vpop.f32.mrb[4].mxu0  ;;  %v433_v56 = vpop.f32.mrb[4].mxu1 }
 0x149   :  { %v4064_v61 = vadd.f32 %v360_v55, %v139_v27  ;;  %v362_v3 = vpop.f32.mrb[5].mxu0  ;;  %v4067_v4 = vadd.f32 %v433_v56, %v4046_v23  ;;  %v435_v8 = vpop.f32.mrb[5].mxu1 }
 0x14a   :  { %v4069_v14 = vadd.f32 %v362_v3, %v143_v30  ;;  %v364_v15 = vpop.f32.mrb[6].mxu0  ;;  %v4072_v16 = vadd.f32 %v435_v8, %v4052_v26  ;;  %v437_v17 = vpop.f32.mrb[6].mxu1 }
 0x14b   :  { %v4074_v18 = vadd.f32 %v364_v15, %v139_v27  ;;  %v366_v19 = vpop.f32.mrb[7].mxu0  ;;  %v4077_v20 = vadd.f32 %v437_v17, %v4046_v23  ;;  %v439_v21 = vpop.f32.mrb[7].mxu1 }
 0x14c   :  { %4513 = vst [vmem:[#allocation22_spill] sm:$0xff] %v4072_v16  ;;  %v4079_v22 = vadd.f32 %v366_v19, %v143_v30  ;;  %v4082_v31 = vadd.f32 %v439_v21, %v4052_v26 }
 0x14d   :  { %4514 = vst [vmem:[#allocation23_spill] sm:$0xff] %v4074_v18  ;;  %4515 = vst [vmem:[#allocation24_spill] sm:$0xff] %v4077_v20 }
 0x14e   :  { %4516 = vst [vmem:[#allocation25_spill] sm:$0xff] %v4079_v22  ;;  %4517 = vst [vmem:[#allocation26_spill] sm:$0xff] %v4082_v31 }
 0x150   :  { %v370_v32 = vpop.f32.mrb[8].mxu0  ;;  %v443_v34 = vpop.f32.mrb[8].mxu1 }
 0x151   :  { %v4084_v44 = vadd.f32 %v370_v32, %v139_v27  ;;  %v372_v55 = vpop.f32.mrb[9].mxu0  ;;  %v4087_v56 = vadd.f32 %v443_v34, %v4046_v23  ;;  %v445_v3 = vpop.f32.mrb[9].mxu1 }
 0x152   :  { %v4089_v8 = vadd.f32 %v372_v55, %v143_v30  ;;  %v374_v15 = vpop.f32.mrb[10].mxu0  ;;  %v4092_v17 = vadd.f32 %v445_v3, %v4052_v26  ;;  %v447_v19 = vpop.f32.mrb[10].mxu1 }
 0x153   :  { %4518 = vst [vmem:[#allocation27_spill] sm:$0xff] %v4084_v44  ;;  %4519 = vst [vmem:[#allocation28_spill] sm:$0xff] %v4087_v56  ;;  %v4094_v0 = vadd.f32 %v374_v15, %v139_v27  ;;  %v376_v21 = vpop.f32.mrb[11].mxu0  ;;  %v4097_v31 = vadd.f32 %v447_v19, %v4046_v23  ;;  %v449_v32 = vpop.f32.mrb[11].mxu1 }
 0x154   :  { %4520 = vst [vmem:[#allocation29_spill] sm:$0xff] %v4089_v8  ;;  %4521 = vst [vmem:[#allocation30_spill] sm:$0xff] %v4092_v17  ;;  %v4099_v44 = vadd.f32 %v376_v21, %v143_v30  ;;  %v4102_v34 = vadd.f32 %v449_v32, %v4052_v26 }
 0x155   :  { %4522 = vst [vmem:[#allocation31_spill] sm:$0xff] %v4094_v0  ;;  %4523 = vst [vmem:[#allocation32_spill] sm:$0xff] %v4097_v31 }
 0x156   :  { %4524 = vst [vmem:[#allocation33_spill] sm:$0xff] %v4099_v44  ;;  %4525 = vst [vmem:[#allocation34_spill] sm:$0xff] %v4102_v34 }
 0x158   :  { %v380_v56 = vpop.f32.mrb[12].mxu0  ;;  %v453_v55 = vpop.f32.mrb[12].mxu1 }
 0x159   :  { %v4104_v8 = vadd.f32 %v380_v56, %v139_v27  ;;  %v382_v22 = vpop.f32.mrb[13].mxu0  ;;  %v4107_v3 = vadd.f32 %v453_v55, %v4046_v23  ;;  %v455_v15 = vpop.f32.mrb[13].mxu1 }
 0x15a   :  { %v4109_v0 = vadd.f32 %v382_v22, %v143_v30  ;;  %v384_v17 = vpop.f32.mrb[14].mxu0  ;;  %v4112_v19 = vadd.f32 %v455_v15, %v4052_v26  ;;  %v457_v21 = vpop.f32.mrb[14].mxu1  ;;  %v351_v22 = vadd.f32 %v4048_v24, %v139_v27  ;;  %v353_v15 = vadd.f32 %v352_v28, %v143_v30 }
 0x15b   :  { %4526 = vst [vmem:[#allocation35_spill] sm:$0xff] %v4104_v8  ;;  %4527 = vst [vmem:[#allocation36_spill] sm:$0xff] %v4107_v3  ;;  %v4114_v44 = vadd.f32 %v384_v17, %v139_v27  ;;  %v386_v32 = vpop.f32.mrb[15].mxu0  ;;  %v4117_v34 = vadd.f32 %v457_v21, %v4046_v23  ;;  %v459_v56 = vpop.f32.mrb[15].mxu1 }
 0x15c   :  { %4528 = vst [vmem:[#allocation37_spill] sm:$0xff] %v4109_v0  ;;  %4529 = vst [vmem:[#allocation38_spill] sm:$0xff] %v4112_v19  ;;  %v4119_v8 = vadd.f32 %v386_v32, %v143_v30  ;;  %v4122_v55 = vadd.f32 %v459_v56, %v4052_v26  ;;  %v424_v0 = vadd.f32 %v4050_v25, %v4046_v23 }
 0x15d   :  { %4530 = vst [vmem:[#allocation39_spill] sm:$0xff] %v4114_v44  ;;  %4531 = vst [vmem:[#allocation40_spill] sm:$0xff] %v4117_v34  ;;  %v426_v19 = vadd.f32 %v425_v29, %v4052_v26 }
 0x15e   :  { %4532 = vst [vmem:[#allocation41_spill] sm:$0xff] %v4119_v8  ;;  %4533 = vst [vmem:[#allocation42_spill] sm:$0xff] %v4122_v55 }
 0x160   :  { %v723_v17 = vpop.f32.mrb[16].mxu0  ;;  %v764_v44 = vpop.f32.mrb[16].mxu1 }
 0x161   :  { %v775_v3 = vadd.f32 %v723_v17, %v351_v22  ;;  %v777_v31 = vadd.f32 %v764_v44, %v424_v0  ;;  %v725_v21 = vpop.f32.mrb[17].mxu0  ;;  %v766_v34 = vpop.f32.mrb[17].mxu1  ;;  %v88_v0 = vld [vmem:[%s4507_s5] sm:$0xff]  ;;  %v4534_v22 = vmov 0   ;;  %s3796_s5 = smov [#allocation14]  }
 0x162   :  { %v776_v20 = vadd.f32 %v725_v21, %v353_v15  ;;  %v778_v32 = vadd.f32 %v766_v34, %v426_v19  ;;  %v727_v8 = vpop.f32.mrb[18].mxu0  ;;  %v768_v18 = vpop.f32.mrb[18].mxu1  ;;  %s2999_s13 = sshll.u32 %s3796_s5, 4  ;;  %s3000_s13 = int_to_ptr.vmem [resolvable:$true] %s2999_s13 }
 0x163   :  { %v3091_v56 = vmul.f32 -1.442695, %v775_v3  ;;  %v728_v55 = vpop.f32.mrb[19].mxu0  ;;  %v769_v16 = vpop.f32.mrb[19].mxu1  ;;  %v3093_v23 = vmul.f32 -1.442695, %v777_v31  ;;  %p3716_p5 = scmp.lt.s32.totalorder %s3000_s13, %s3000_s13 }
 0x164   :  { %v3092_v24 = vmul.f32 -1.442695, %v776_v20  ;;  %s3711_s21 = scalar_lea.vmem %s3000_s13, 128 }
 0x165   :  { %3495 = vpow2.f32 %v3091_v56  ;;  %p3712_p4 = scmp.ne.s32.totalorder %s3000_s13, %s3711_s21  ;;  %p3717_p6 = scmp.lt.s32.totalorder %s3711_s21, %s3711_s21 }
 0x166   :  { %3497 = vpow2.f32 %v3092_v24 }
 0x167   :  { %3499 = vpow2.f32 %v3093_v23  ;;  %p3718_p7 = por %p3717_p6, %p3716_p5 }
 0x169   :  { %p3719_p8 = pnand %p3718_p7, %p3712_p4 }
 0x16f   :  { %v3496_v25 = vpop.eup %3495 }
 0x170   :  { %v782_v27 = vadd.f32 1.0, %v3496_v25  ;;  %v3498_v26 = vpop.eup %3497 }
 0x171   :  { %v788_v28 = vadd.f32 1.0, %v3498_v26  ;;  %v3500_v29 = vpop.eup %3499 }
 0x172   :  { %3501 = vrcp.f32 %v782_v27  ;;  %v794_v44 = vadd.f32 1.0, %v3500_v29 }
 0x173   :  { %3503 = vtanh.f32 %v778_v32 }
 0x174   :  { %3505 = vrcp.f32 %v788_v28 }
 0x175   :  { %3507 = vrcp.f32 %v794_v44 }
 0x17c   :  { %v3502_v30 = vpop.eup %3501 }
 0x17d   :  { %v3504_v18 = vpop.eup %3503  ;;  %v798_v16 = vmul.f32 %v3502_v30, %v88_v0 }
 0x17e   :  { %v3506_v20 = vpop.eup %3505 }
 0x17f   :  { %v799_v8 = vmul.f32 %v3506_v20, %v3504_v18  ;;  %v3508_v34 = vpop.eup %3507 }
 0x181   :  { %v4131_v31 = vadd.f32 %v799_v8, %v798_v16 }
 0x183   :  { %3509 = vtanh.f32 %v4131_v31 }
 0x18d   :  { %v3510_v3 = vpop.eup %3509 }
 0x18e   :  { %v802_v19 = vmul.f32 %v3510_v3, %v3508_v34 }
 0x190   :  { %803 = vst [vmem:[#allocation13] sm:$0xff] %v802_v19  ;;  %v804_v55 = vpack.c.bf16 %v802_v19, %v802_v19 }
 0x192   :  { %1030 = vmatmul.mubr.bf16.vlgmr.msra.gmra.mrb[20].mxu0 %v804_v55  ;;  %1071 = vmatmul.mubr.bf16.vlgmr.msra.gmra.mrb[20].mxu1 %v804_v55 }
 0x193   :  { %1308 = vmatpush1.bf16.msra.mxu0 %v3907_v38  ;;  %1349 = vmatpush1.bf16.msra.mxu1 %v3909_v39 }
 0x194   :  { %1309 = vmatprep.subr.bf16.mxu0 %v3913_v40  ;;  %1350 = vmatprep.subr.bf16.mxu1 %v3915_v41 }
 0x195   :  { %1339 = vmatprep.mubr.bf16.mxu0 %v4534_v22  ;;  %1380 = vmatprep.mubr.bf16.mxu1 %v4534_v22 }
 0x197   :  { %1310 = vmatpush1.bf16.msra.mxu0 %v3917_v42  ;;  %1351 = vmatpush1.bf16.msra.mxu1 %v3919_v43 }
 0x198   :  { %1311 = vmatprep.subr.bf16.mxu0 %v3925_v46  ;;  %1352 = vmatprep.subr.bf16.mxu1 %v3927_v47 }
 0x19b   :  { %1312 = vmatpush1.bf16.msra.mxu0 %v3931_v49  ;;  %1353 = vmatpush1.bf16.msra.mxu1 %v3933_v50 }
 0x19c   :  { %1313 = vmatprep.subr.bf16.mxu0 %v3937_v51  ;;  %1354 = vmatprep.subr.bf16.mxu1 %v3941_v52 }
 0x19f   :  { %1314 = vmatpush1.bf16.msra.mxu0 %v3943_v53  ;;  %1355 = vmatpush1.bf16.msra.mxu1 %v3945_v54 }
 0x1a0   :  { %1315 = vmatprep.subr.bf16.mxu0 %v3951_v57  ;;  %1356 = vmatprep.subr.bf16.mxu1 %v3953_v58 }
 0x1a3   :  { %1316 = vmatpush1.bf16.msra.mxu0 %v3957_v59  ;;  %1357 = vmatpush1.bf16.msra.mxu1 %v3959_v60 }
 0x1a4   :  { %1317 = vmatprep.subr.bf16.mxu0 %v3961_v62  ;;  %1358 = vmatprep.subr.bf16.mxu1 %v3963_v63 }
 0x1a7   :  { %1318 = vmatpush1.bf16.msra.mxu0 %v3969_v1  ;;  %1359 = vmatpush1.bf16.msra.mxu1 %v3971_v2 }
 0x1a8   :  { %1319 = vmatprep.subr.bf16.mxu0 %v3973_v5  ;;  %1360 = vmatprep.subr.bf16.mxu1 %v3975_v6 }
 0x1ab   :  { %1320 = vmatpush1.bf16.msra.mxu0 %v3983_v7  ;;  %1361 = vmatpush1.bf16.msra.mxu1 %v3987_v9 }
 0x1ac   :  { %1321 = vmatprep.subr.bf16.mxu0 %v3991_v10  ;;  %1362 = vmatprep.subr.bf16.mxu1 %v3993_v11 }
 0x1af   :  { %1322 = vmatpush1.bf16.msra.mxu0 %v3997_v12  ;;  %1363 = vmatpush1.bf16.msra.mxu1 %v3999_v13 }
 0x1b0   :  { %1617 = vmatprep.subr.bf16.mxu0 %v3903_v35  ;;  %1658 = vmatprep.subr.bf16.mxu1 %v3905_v36 }
 0x265   :  { %v1031_v15 = vpop.f32.mrb[20].mxu0  ;;  %v1072_v17 = vpop.f32.mrb[20].mxu1 }
 0x266   :  { %v1084_v21 = vadd.f32 %v1031_v15, %v4054_v33  ;;  %v1086_v32 = vadd.f32 %v1072_v17, %v4057_v37  ;;  %v1033_v56 = vpop.f32.mrb[21].mxu0  ;;  %v1074_v24 = vpop.f32.mrb[21].mxu1 }
 0x267   :  { %v1085_v23 = vadd.f32 %v1033_v56, %v4059_v45  ;;  %v1087_v25 = vadd.f32 %v1074_v24, %v4062_v48  ;;  %v1035_v27 = vpop.f32.mrb[22].mxu0  ;;  %v1076_v26 = vpop.f32.mrb[22].mxu1  ;;  %v4230_v56 = vld [vmem:[#allocation10 + $0x24] ss:$16 sps:$4 sm:$0xff]   ;;  %v4232_v24 = vld [vmem:[#allocation10 + $0x2c] ss:$16 sps:$4 sm:$0xff]  }
 0x268   :  { %v3126_v28 = vmul.f32 -1.442695, %v1084_v21  ;;  %v1036_v0 = vpop.f32.mrb[23].mxu0  ;;  %v1077_v29 = vpop.f32.mrb[23].mxu1  ;;  %v3128_v36 = vmul.f32 -1.442695, %v1086_v32 }
 0x269   :  { %v3127_v35 = vmul.f32 -1.442695, %v1085_v23  ;;  %v4222_v21 = vld [vmem:[#allocation10] ss:$16 sps:$4 sm:$0xff]   ;;  %v4224_v32 = vld [vmem:[#allocation10 + $0x8] ss:$16 sps:$4 sm:$0xff]  }
 0x26a   :  { %3511 = vpow2.f32 %v3126_v28  ;;  %v4234_v23 = vld [vmem:[#allocation10 + $0x20] ss:$16 sps:$4 sm:$0xff]   ;;  %v4242_v27 = vld [vmem:[#allocation10 + $0x44] ss:$16 sps:$4 sm:$0xff]   ;;  %v4244_v26 = vld [vmem:[#allocation10 + $0x4c] ss:$16 sps:$4 sm:$0xff]  }
 0x26b   :  { %3513 = vpow2.f32 %v3127_v35  ;;  %v4246_v28 = vld [vmem:[#allocation10 + $0x40] ss:$16 sps:$4 sm:$0xff]   ;;  %v4248_v0 = vld [vmem:[#allocation10 + $0x48] ss:$16 sps:$4 sm:$0xff]   ;;  %v4254_v29 = vld [vmem:[#allocation10 + $0x64] ss:$16 sps:$4 sm:$0xff]  }
 0x26c   :  { %3515 = vpow2.f32 %v3128_v36  ;;  %v4256_v35 = vld [vmem:[#allocation10 + $0x6c] ss:$16 sps:$4 sm:$0xff]   ;;  %v4258_v36 = vld [vmem:[#allocation10 + $0x60] ss:$16 sps:$4 sm:$0xff]  }
 0x274   :  { %v3512_v30 = vpop.eup %3511 }
 0x275   :  { %v1091_v18 = vadd.f32 1.0, %v3512_v30  ;;  %v3514_v33 = vpop.eup %3513  ;;  %v4260_v30 = vld [vmem:[#allocation10 + $0x68] ss:$16 sps:$4 sm:$0xff]  }
 0x276   :  { %v1097_v37 = vadd.f32 1.0, %v3514_v33  ;;  %v3516_v45 = vpop.eup %3515  ;;  %v4268_v33 = vld [vmem:[#allocation10 + $0x8c] ss:$16 sps:$4 sm:$0xff]  }
 0x277   :  { %3517 = vrcp.f32 %v1091_v18  ;;  %v1103_v8 = vadd.f32 1.0, %v3516_v45  ;;  %v4266_v18 = vld [vmem:[#allocation10 + $0x84] ss:$16 sps:$4 sm:$0xff]   ;;  %v4272_v45 = vld [vmem:[#allocation10 + $0x88] ss:$16 sps:$4 sm:$0xff]  }
 0x278   :  { %3519 = vtanh.f32 %v1087_v25  ;;  %v4236_v25 = vld [vmem:[#allocation10 + $0x28] ss:$16 sps:$4 sm:$0xff]  }
 0x279   :  { %3521 = vrcp.f32 %v1097_v37  ;;  %v4270_v37 = vld [vmem:[#allocation10 + $0x80] ss:$16 sps:$4 sm:$0xff]  }
 0x27a   :  { %3523 = vrcp.f32 %v1103_v8  ;;  %v4286_v8 = vld [vmem:[#allocation10 + $0xc4] ss:$16 sps:$4 sm:$0xff]  }
 0x281   :  { %v3518_v16 = vpop.eup %3517 }
 0x282   :  { %v3520_v48 = vpop.eup %3519  ;;  %v1107_v20 = vmul.f32 %v3518_v16, %v4131_v31  ;;  %v4220_v31 = vld [vmem:[#allocation10 + $0xc] ss:$16 sps:$4 sm:$0xff]   ;;  %v4278_v16 = vld [vmem:[#allocation10 + $0xa0] ss:$16 sps:$4 sm:$0xff]  }
 0x283   :  { %v3522_v44 = vpop.eup %3521 }
 0x284   :  { %v1108_v34 = vmul.f32 %v3522_v44, %v3520_v48  ;;  %v3524_v19 = vpop.eup %3523  ;;  %v4280_v48 = vld [vmem:[#allocation10 + $0xa4] ss:$16 sps:$4 sm:$0xff]   ;;  %v4284_v44 = vld [vmem:[#allocation10 + $0xac] ss:$16 sps:$4 sm:$0xff]  }
 0x286   :  { %v4173_v3 = vadd.f32 %v1108_v34, %v1107_v20  ;;  %v4282_v20 = vld [vmem:[#allocation10 + $0xa8] ss:$16 sps:$4 sm:$0xff]   ;;  %v4289_v34 = vld [vmem:[#allocation10 + $0xcc] ss:$16 sps:$4 sm:$0xff]  }
 0x288   :  { %3525 = vtanh.f32 %v4173_v3 }
 0x292   :  { %v3526_v55 = vpop.eup %3525 }
 0x293   :  { %v1111_v15 = vmul.f32 %v3526_v55, %v3524_v19  ;;  %v4296_v19 = vld [vmem:[#allocation10 + $0xc8] ss:$16 sps:$4 sm:$0xff]   ;;  %v4300_v55 = vld [vmem:[#allocation10 + $0xe4] ss:$16 sps:$4 sm:$0xff]  }
 0x295   :  { %1113 = vst [vmem:[#allocation13 + $0x8] sm:$0xff] %v1111_v15  ;;  %v1114_v17 = vpack.c.bf16 %v1111_v15, %v1111_v15  ;;  %v4302_v15 = vld [vmem:[#allocation10 + $0xec] ss:$16 sps:$4 sm:$0xff]  }
 0x297   :  { %1340 = vmatmul.mubr.bf16.vlgmr.msra.gmra.mrb[24].mxu0 %v1114_v17  ;;  %1381 = vmatmul.mubr.bf16.vlgmr.msra.gmra.mrb[24].mxu1 %v1114_v17  ;;  %v4306_v17 = vld [vmem:[#allocation10 + $0xe0] ss:$16 sps:$4 sm:$0xff]  }
 0x298   :  { %1618 = vmatpush1.bf16.msra.mxu0 %v3907_v38  ;;  %1659 = vmatpush1.bf16.msra.mxu1 %v3909_v39 }
 0x299   :  { %1619 = vmatprep.subr.bf16.mxu0 %v3913_v40  ;;  %1660 = vmatprep.subr.bf16.mxu1 %v3915_v41 }
 0x29a   :  { %1649 = vmatprep.mubr.bf16.mxu0 %v4534_v22  ;;  %1690 = vmatprep.mubr.bf16.mxu1 %v4534_v22 }
 0x29c   :  { %1620 = vmatpush1.bf16.msra.mxu0 %v3917_v42  ;;  %1661 = vmatpush1.bf16.msra.mxu1 %v3919_v43 }
 0x29d   :  { %1621 = vmatprep.subr.bf16.mxu0 %v3925_v46  ;;  %1662 = vmatprep.subr.bf16.mxu1 %v3927_v47  ;;  %v4535_v47 = vld [vmem:[#allocation22_spill] sm:$0xff] }
 0x2a0   :  { %1622 = vmatpush1.bf16.msra.mxu0 %v3931_v49  ;;  %1663 = vmatpush1.bf16.msra.mxu1 %v3933_v50 }
 0x2a1   :  { %1623 = vmatprep.subr.bf16.mxu0 %v3937_v51  ;;  %1664 = vmatprep.subr.bf16.mxu1 %v3941_v52 }
 0x2a4   :  { %1624 = vmatpush1.bf16.msra.mxu0 %v3943_v53  ;;  %1665 = vmatpush1.bf16.msra.mxu1 %v3945_v54 }
 0x2a5   :  { %1625 = vmatprep.subr.bf16.mxu0 %v3951_v57  ;;  %1666 = vmatprep.subr.bf16.mxu1 %v3953_v58 }
 0x2a8   :  { %1626 = vmatpush1.bf16.msra.mxu0 %v3957_v59  ;;  %1667 = vmatpush1.bf16.msra.mxu1 %v3959_v60 }
 0x2a9   :  { %1627 = vmatprep.subr.bf16.mxu0 %v3961_v62  ;;  %1668 = vmatprep.subr.bf16.mxu1 %v3963_v63 }
 0x2ac   :  { %1628 = vmatpush1.bf16.msra.mxu0 %v3969_v1  ;;  %1669 = vmatpush1.bf16.msra.mxu1 %v3971_v2 }
 0x2ad   :  { %1629 = vmatprep.subr.bf16.mxu0 %v3973_v5  ;;  %1670 = vmatprep.subr.bf16.mxu1 %v3975_v6 }
 0x2b0   :  { %1630 = vmatpush1.bf16.msra.mxu0 %v3983_v7  ;;  %1671 = vmatpush1.bf16.msra.mxu1 %v3987_v9 }
 0x2b1   :  { %1631 = vmatprep.subr.bf16.mxu0 %v3991_v10  ;;  %1672 = vmatprep.subr.bf16.mxu1 %v3993_v11 }
 0x2b4   :  { %1632 = vmatpush1.bf16.msra.mxu0 %v3997_v12  ;;  %1673 = vmatpush1.bf16.msra.mxu1 %v3999_v13 }
 0x2b5   :  { %1968 = vmatprep.subr.bf16.mxu1 %v4220_v31 }
 0x36a   :  { %v1341_v38 = vpop.f32.mrb[24].mxu0  ;;  %v1382_v39 = vpop.f32.mrb[24].mxu1 }
 0x36b   :  { %v1394_v40 = vadd.f32 %v1341_v38, %v4064_v61  ;;  %v1396_v41 = vadd.f32 %v1382_v39, %v4067_v4  ;;  %v1343_v42 = vpop.f32.mrb[25].mxu0  ;;  %v1384_v43 = vpop.f32.mrb[25].mxu1  ;;  %v4308_v38 = vld [vmem:[#allocation10 + $0xe8] ss:$16 sps:$4 sm:$0xff]  }
 0x36c   :  { %v1395_v46 = vadd.f32 %v1343_v42, %v4069_v14  ;;  %v1397_v49 = vadd.f32 %v1384_v43, %v4535_v47  ;;  %v1345_v50 = vpop.f32.mrb[26].mxu0  ;;  %v1386_v51 = vpop.f32.mrb[26].mxu1  ;;  %v4218_v14 = vld [vmem:[#allocation10 + $0x4] ss:$16 sps:$4 sm:$0xff]  }
 0x36d   :  { %v3161_v52 = vmul.f32 -1.442695, %v1394_v40  ;;  %v1346_v53 = vpop.f32.mrb[27].mxu0  ;;  %v1387_v54 = vpop.f32.mrb[27].mxu1  ;;  %v3163_v58 = vmul.f32 -1.442695, %v1396_v41  ;;  %1927 = vmatprep.subr.bf16.mxu0 %v4218_v14 }
 0x36e   :  { %v3162_v57 = vmul.f32 -1.442695, %v1395_v46  ;;  %v4536_v41 = vld [vmem:[#allocation23_spill] sm:$0xff]  ;;  %v4537_v43 = vld [vmem:[#allocation24_spill] sm:$0xff]  ;;  %v4538_v50 = vld [vmem:[#allocation25_spill] sm:$0xff] }
 0x36f   :  { %3527 = vpow2.f32 %v3161_v52  ;;  %v4539_v52 = vld [vmem:[#allocation26_spill] sm:$0xff] }
 0x370   :  { %3529 = vpow2.f32 %v3162_v57 }
 0x371   :  { %3531 = vpow2.f32 %v3163_v58 }
 0x379   :  { %v3528_v59 = vpop.eup %3527 }
 0x37a   :  { %v1401_v60 = vadd.f32 1.0, %v3528_v59  ;;  %v3530_v62 = vpop.eup %3529 }
 0x37b   :  { %v1407_v63 = vadd.f32 1.0, %v3530_v62  ;;  %v3532_v1 = vpop.eup %3531 }
 0x37c   :  { %3533 = vrcp.f32 %v1401_v60  ;;  %v1413_v9 = vadd.f32 1.0, %v3532_v1 }
 0x37d   :  { %3535 = vtanh.f32 %v1397_v49 }
 0x37e   :  { %3537 = vrcp.f32 %v1407_v63 }
 0x37f   :  { %3539 = vrcp.f32 %v1413_v9 }
 0x386   :  { %v3534_v2 = vpop.eup %3533 }
 0x387   :  { %v3536_v5 = vpop.eup %3535  ;;  %v1417_v6 = vmul.f32 %v3534_v2, %v4173_v3  ;;  %v4294_v3 = vld [vmem:[#allocation10 + $0xc0] ss:$16 sps:$4 sm:$0xff]  }
 0x388   :  { %v3538_v7 = vpop.eup %3537 }
 0x389   :  { %v1418_v10 = vmul.f32 %v3538_v7, %v3536_v5  ;;  %v3540_v12 = vpop.eup %3539 }
 0x38b   :  { %v4213_v11 = vadd.f32 %v1418_v10, %v1417_v6 }
 0x38d   :  { %3541 = vtanh.f32 %v4213_v11 }
 0x397   :  { %v3542_v13 = vpop.eup %3541 }
 0x398   :  { %v1421_v61 = vmul.f32 %v3542_v13, %v3540_v12 }
 0x39a   :  { %1423 = vst [vmem:[#allocation13 + $0x10] sm:$0xff] %v1421_v61  ;;  %v1424_v4 = vpack.c.bf16 %v1421_v61, %v1421_v61 }
 0x39c   :  { %1650 = vmatmul.mubr.bf16.vlgmr.msra.gmra.mrb[28].mxu0 %v1424_v4  ;;  %1691 = vmatmul.mubr.bf16.vlgmr.msra.gmra.mrb[28].mxu1 %v1424_v4 }
 0x39d   :  { %1959 = vmatprep.mubr.bf16.mxu0 %v4534_v22  ;;  %2000 = vmatprep.mubr.bf16.mxu1 %v4534_v22 }
 0x39e   :  { %1928 = vmatpush1.bf16.msra.mxu0 %v4222_v21  ;;  %1969 = vmatpush1.bf16.msra.mxu1 %v4224_v32 }
 0x39f   :  { %1929 = vmatprep.subr.bf16.mxu0 %v4230_v56  ;;  %1970 = vmatprep.subr.bf16.mxu1 %v4232_v24 }
 0x3a2   :  { %1930 = vmatpush1.bf16.msra.mxu0 %v4234_v23  ;;  %1971 = vmatpush1.bf16.msra.mxu1 %v4236_v25 }
 0x3a3   :  { %1931 = vmatprep.subr.bf16.mxu0 %v4242_v27  ;;  %1972 = vmatprep.subr.bf16.mxu1 %v4244_v26 }
 0x3a6   :  { %1932 = vmatpush1.bf16.msra.mxu0 %v4246_v28  ;;  %1973 = vmatpush1.bf16.msra.mxu1 %v4248_v0 }
 0x3a7   :  { %1933 = vmatprep.subr.bf16.mxu0 %v4254_v29  ;;  %1974 = vmatprep.subr.bf16.mxu1 %v4256_v35 }
 0x3aa   :  { %1934 = vmatpush1.bf16.msra.mxu0 %v4258_v36  ;;  %1975 = vmatpush1.bf16.msra.mxu1 %v4260_v30 }
 0x3ab   :  { %1935 = vmatprep.subr.bf16.mxu0 %v4266_v18  ;;  %1976 = vmatprep.subr.bf16.mxu1 %v4268_v33 }
 0x3ae   :  { %1936 = vmatpush1.bf16.msra.mxu0 %v4270_v37  ;;  %1977 = vmatpush1.bf16.msra.mxu1 %v4272_v45 }
 0x3af   :  { %1937 = vmatprep.subr.bf16.mxu0 %v4280_v48  ;;  %1978 = vmatprep.subr.bf16.mxu1 %v4284_v44 }
 0x3b2   :  { %1938 = vmatpush1.bf16.msra.mxu0 %v4278_v16  ;;  %1979 = vmatpush1.bf16.msra.mxu1 %v4282_v20 }
 0x3b3   :  { %1939 = vmatprep.subr.bf16.mxu0 %v4286_v8  ;;  %1980 = vmatprep.subr.bf16.mxu1 %v4289_v34 }
 0x3b6   :  { %1940 = vmatpush1.bf16.msra.mxu0 %v4294_v3  ;;  %1981 = vmatpush1.bf16.msra.mxu1 %v4296_v19 }
 0x3b7   :  { %1941 = vmatprep.subr.bf16.mxu0 %v4300_v55  ;;  %1982 = vmatprep.subr.bf16.mxu1 %v4302_v15 }
 0x3ba   :  { %1942 = vmatpush1.bf16.msra.mxu0 %v4306_v17  ;;  %1983 = vmatpush1.bf16.msra.mxu1 %v4308_v38 }
 0x3bb   :  { %2237 = vmatprep.subr.bf16.mxu0 %v4218_v14  ;;  %2278 = vmatprep.subr.bf16.mxu1 %v4220_v31 }
 0x46f   :  { %v1651_v39 = vpop.f32.mrb[28].mxu0  ;;  %v1692_v40 = vpop.f32.mrb[28].mxu1 }
 0x470   :  { %v1704_v42 = vadd.f32 %v1651_v39, %v4536_v41  ;;  %v1706_v46 = vadd.f32 %v1692_v40, %v4537_v43  ;;  %v1653_v47 = vpop.f32.mrb[29].mxu0  ;;  %v1694_v49 = vpop.f32.mrb[29].mxu1 }
 0x471   :  { %v1705_v51 = vadd.f32 %v1653_v47, %v4538_v50  ;;  %v1707_v53 = vadd.f32 %v1694_v49, %v4539_v52  ;;  %v1655_v54 = vpop.f32.mrb[30].mxu0  ;;  %v1696_v57 = vpop.f32.mrb[30].mxu1  ;;  %v4540_v47 = vld [vmem:[#allocation27_spill] sm:$0xff]  ;;  %v4541_v50 = vld [vmem:[#allocation28_spill] sm:$0xff] }
 0x472   :  { %v3196_v58 = vmul.f32 -1.442695, %v1704_v42  ;;  %v1656_v59 = vpop.f32.mrb[31].mxu0  ;;  %v1697_v60 = vpop.f32.mrb[31].mxu1  ;;  %v3198_v63 = vmul.f32 -1.442695, %v1706_v46 }
 0x473   :  { %v3197_v62 = vmul.f32 -1.442695, %v1705_v51  ;;  %v4542_v54 = vld [vmem:[#allocation29_spill] sm:$0xff] }
 0x474   :  { %3543 = vpow2.f32 %v3196_v58  ;;  %v4543_v58 = vld [vmem:[#allocation30_spill] sm:$0xff] }
 0x475   :  { %3545 = vpow2.f32 %v3197_v62 }
 0x476   :  { %3547 = vpow2.f32 %v3198_v63 }
 0x47e   :  { %v3544_v1 = vpop.eup %3543 }
 0x47f   :  { %v1711_v2 = vadd.f32 1.0, %v3544_v1  ;;  %v3546_v5 = vpop.eup %3545 }
 0x480   :  { %v1717_v6 = vadd.f32 1.0, %v3546_v5  ;;  %v3548_v7 = vpop.eup %3547 }
 0x481   :  { %3549 = vrcp.f32 %v1711_v2  ;;  %v1723_v61 = vadd.f32 1.0, %v3548_v7 }
 0x482   :  { %3551 = vtanh.f32 %v1707_v53 }
 0x483   :  { %3553 = vrcp.f32 %v1717_v6 }
 0x484   :  { %3555 = vrcp.f32 %v1723_v61 }
 0x48b   :  { %v3550_v9 = vpop.eup %3549 }
 0x48c   :  { %v3552_v10 = vpop.eup %3551  ;;  %v1727_v12 = vmul.f32 %v3550_v9, %v4213_v11 }
 0x48d   :  { %v3554_v13 = vpop.eup %3553 }
 0x48e   :  { %v1728_v4 = vmul.f32 %v3554_v13, %v3552_v10  ;;  %v3556_v40 = vpop.eup %3555 }
 0x490   :  { %v4321_v39 = vadd.f32 %v1728_v4, %v1727_v12 }
 0x492   :  { %3557 = vtanh.f32 %v4321_v39 }
 0x49c   :  { %v3558_v41 = vpop.eup %3557 }
 0x49d   :  { %v1731_v42 = vmul.f32 %v3558_v41, %v3556_v40 }
 0x49f   :  { %1733 = vst [vmem:[#allocation13 + $0x18] sm:$0xff] %v1731_v42  ;;  %v1734_v43 = vpack.c.bf16 %v1731_v42, %v1731_v42 }
 0x4a1   :  { %1960 = vmatmul.mubr.bf16.vlgmr.msra.gmra.mrb[32].mxu0 %v1734_v43  ;;  %2001 = vmatmul.mubr.bf16.vlgmr.msra.gmra.mrb[32].mxu1 %v1734_v43 }
 0x4a2   :  { %2238 = vmatpush1.bf16.msra.mxu0 %v4222_v21  ;;  %2279 = vmatpush1.bf16.msra.mxu1 %v4224_v32 }
 0x4a3   :  { %2239 = vmatprep.subr.bf16.mxu0 %v4230_v56  ;;  %2280 = vmatprep.subr.bf16.mxu1 %v4232_v24 }
 0x4a4   :  { %2269 = vmatprep.mubr.bf16.mxu0 %v4534_v22  ;;  %2310 = vmatprep.mubr.bf16.mxu1 %v4534_v22 }
 0x4a6   :  { %2240 = vmatpush1.bf16.msra.mxu0 %v4234_v23  ;;  %2281 = vmatpush1.bf16.msra.mxu1 %v4236_v25 }
 0x4a7   :  { %2241 = vmatprep.subr.bf16.mxu0 %v4242_v27  ;;  %2282 = vmatprep.subr.bf16.mxu1 %v4244_v26 }
 0x4aa   :  { %2242 = vmatpush1.bf16.msra.mxu0 %v4246_v28  ;;  %2283 = vmatpush1.bf16.msra.mxu1 %v4248_v0 }
 0x4ab   :  { %2243 = vmatprep.subr.bf16.mxu0 %v4254_v29  ;;  %2284 = vmatprep.subr.bf16.mxu1 %v4256_v35 }
 0x4ae   :  { %2244 = vmatpush1.bf16.msra.mxu0 %v4258_v36  ;;  %2285 = vmatpush1.bf16.msra.mxu1 %v4260_v30 }
 0x4af   :  { %2245 = vmatprep.subr.bf16.mxu0 %v4266_v18  ;;  %2286 = vmatprep.subr.bf16.mxu1 %v4268_v33 }
 0x4b2   :  { %2246 = vmatpush1.bf16.msra.mxu0 %v4270_v37  ;;  %2287 = vmatpush1.bf16.msra.mxu1 %v4272_v45 }
 0x4b3   :  { %2247 = vmatprep.subr.bf16.mxu0 %v4280_v48  ;;  %2288 = vmatprep.subr.bf16.mxu1 %v4284_v44 }
 0x4b6   :  { %2248 = vmatpush1.bf16.msra.mxu0 %v4278_v16  ;;  %2289 = vmatpush1.bf16.msra.mxu1 %v4282_v20 }
 0x4b7   :  { %2249 = vmatprep.subr.bf16.mxu0 %v4286_v8  ;;  %2290 = vmatprep.subr.bf16.mxu1 %v4289_v34 }
 0x4ba   :  { %2250 = vmatpush1.bf16.msra.mxu0 %v4294_v3  ;;  %2291 = vmatpush1.bf16.msra.mxu1 %v4296_v19 }
 0x4bb   :  { %2251 = vmatprep.subr.bf16.mxu0 %v4300_v55  ;;  %2292 = vmatprep.subr.bf16.mxu1 %v4302_v15 }
 0x4be   :  { %2252 = vmatpush1.bf16.msra.mxu0 %v4306_v17  ;;  %2293 = vmatpush1.bf16.msra.mxu1 %v4308_v38 }
 0x4bf   :  { %2547 = vmatprep.subr.bf16.mxu0 %v4218_v14  ;;  %2588 = vmatprep.subr.bf16.mxu1 %v4220_v31 }
 0x574   :  { %v1961_v11 = vpop.f32.mrb[32].mxu0  ;;  %v2002_v46 = vpop.f32.mrb[32].mxu1 }
 0x575   :  { %v2014_v49 = vadd.f32 %v1961_v11, %v4540_v47  ;;  %v2016_v51 = vadd.f32 %v2002_v46, %v4541_v50  ;;  %v1963_v52 = vpop.f32.mrb[33].mxu0  ;;  %v2004_v53 = vpop.f32.mrb[33].mxu1 }
 0x576   :  { %v2015_v57 = vadd.f32 %v1963_v52, %v4542_v54  ;;  %v2017_v59 = vadd.f32 %v2004_v53, %v4543_v58  ;;  %v1965_v60 = vpop.f32.mrb[34].mxu0  ;;  %v2006_v62 = vpop.f32.mrb[34].mxu1  ;;  %v4544_v52 = vld [vmem:[#allocation31_spill] sm:$0xff]  ;;  %v4545_v54 = vld [vmem:[#allocation32_spill] sm:$0xff] }
 0x577   :  { %v3231_v63 = vmul.f32 -1.442695, %v2014_v49  ;;  %v1966_v1 = vpop.f32.mrb[35].mxu0  ;;  %v2007_v2 = vpop.f32.mrb[35].mxu1  ;;  %v3233_v6 = vmul.f32 -1.442695, %v2016_v51 }
 0x578   :  { %v3232_v5 = vmul.f32 -1.442695, %v2015_v57  ;;  %v4546_v60 = vld [vmem:[#allocation33_spill] sm:$0xff] }
 0x579   :  { %3559 = vpow2.f32 %v3231_v63  ;;  %v4547_v63 = vld [vmem:[#allocation34_spill] sm:$0xff] }
 0x57a   :  { %3561 = vpow2.f32 %v3232_v5 }
 0x57b   :  { %3563 = vpow2.f32 %v3233_v6 }
 0x583   :  { %v3560_v7 = vpop.eup %3559 }
 0x584   :  { %v2021_v9 = vadd.f32 1.0, %v3560_v7  ;;  %v3562_v10 = vpop.eup %3561 }
 0x585   :  { %v2027_v12 = vadd.f32 1.0, %v3562_v10  ;;  %v3564_v13 = vpop.eup %3563 }
 0x586   :  { %3565 = vrcp.f32 %v2021_v9  ;;  %v2033_v42 = vadd.f32 1.0, %v3564_v13 }
 0x587   :  { %3567 = vtanh.f32 %v2017_v59 }
 0x588   :  { %3569 = vrcp.f32 %v2027_v12 }
 0x589   :  { %3571 = vrcp.f32 %v2033_v42 }
 0x590   :  { %v3566_v61 = vpop.eup %3565 }
 0x591   :  { %v3568_v4 = vpop.eup %3567  ;;  %v2037_v40 = vmul.f32 %v3566_v61, %v4321_v39 }
 0x592   :  { %v3570_v41 = vpop.eup %3569 }
 0x593   :  { %v2038_v43 = vmul.f32 %v3570_v41, %v3568_v4  ;;  %v3572_v46 = vpop.eup %3571 }
 0x595   :  { %v4363_v11 = vadd.f32 %v2038_v43, %v2037_v40 }
 0x597   :  { %3573 = vtanh.f32 %v4363_v11 }
 0x5a1   :  { %v3574_v47 = vpop.eup %3573 }
 0x5a2   :  { %v2041_v49 = vmul.f32 %v3574_v47, %v3572_v46 }
 0x5a4   :  { %2043 = vst [vmem:[#allocation13 + $0x20] sm:$0xff] %v2041_v49  ;;  %v2044_v50 = vpack.c.bf16 %v2041_v49, %v2041_v49 }
 0x5a6   :  { %2270 = vmatmul.mubr.bf16.vlgmr.msra.gmra.mrb[36].mxu0 %v2044_v50  ;;  %2311 = vmatmul.mubr.bf16.vlgmr.msra.gmra.mrb[36].mxu1 %v2044_v50 }
 0x5a7   :  { %2548 = vmatpush1.bf16.msra.mxu0 %v4222_v21  ;;  %2589 = vmatpush1.bf16.msra.mxu1 %v4224_v32 }
 0x5a8   :  { %2549 = vmatprep.subr.bf16.mxu0 %v4230_v56  ;;  %2590 = vmatprep.subr.bf16.mxu1 %v4232_v24 }
 0x5a9   :  { %2579 = vmatprep.mubr.bf16.mxu0 %v4534_v22  ;;  %2620 = vmatprep.mubr.bf16.mxu1 %v4534_v22 }
 0x5ab   :  { %2550 = vmatpush1.bf16.msra.mxu0 %v4234_v23  ;;  %2591 = vmatpush1.bf16.msra.mxu1 %v4236_v25 }
 0x5ac   :  { %2551 = vmatprep.subr.bf16.mxu0 %v4242_v27  ;;  %2592 = vmatprep.subr.bf16.mxu1 %v4244_v26 }
 0x5af   :  { %2552 = vmatpush1.bf16.msra.mxu0 %v4246_v28  ;;  %2593 = vmatpush1.bf16.msra.mxu1 %v4248_v0 }
 0x5b0   :  { %2553 = vmatprep.subr.bf16.mxu0 %v4254_v29  ;;  %2594 = vmatprep.subr.bf16.mxu1 %v4256_v35 }
 0x5b3   :  { %2554 = vmatpush1.bf16.msra.mxu0 %v4258_v36  ;;  %2595 = vmatpush1.bf16.msra.mxu1 %v4260_v30 }
 0x5b4   :  { %2555 = vmatprep.subr.bf16.mxu0 %v4266_v18  ;;  %2596 = vmatprep.subr.bf16.mxu1 %v4268_v33 }
 0x5b7   :  { %2556 = vmatpush1.bf16.msra.mxu0 %v4270_v37  ;;  %2597 = vmatpush1.bf16.msra.mxu1 %v4272_v45 }
 0x5b8   :  { %2557 = vmatprep.subr.bf16.mxu0 %v4280_v48  ;;  %2598 = vmatprep.subr.bf16.mxu1 %v4284_v44 }
 0x5bb   :  { %2558 = vmatpush1.bf16.msra.mxu0 %v4278_v16  ;;  %2599 = vmatpush1.bf16.msra.mxu1 %v4282_v20 }
 0x5bc   :  { %2559 = vmatprep.subr.bf16.mxu0 %v4286_v8  ;;  %2600 = vmatprep.subr.bf16.mxu1 %v4289_v34 }
 0x5bf   :  { %2560 = vmatpush1.bf16.msra.mxu0 %v4294_v3  ;;  %2601 = vmatpush1.bf16.msra.mxu1 %v4296_v19 }
 0x5c0   :  { %2561 = vmatprep.subr.bf16.mxu0 %v4300_v55  ;;  %2602 = vmatprep.subr.bf16.mxu1 %v4302_v15 }
 0x5c3   :  { %2562 = vmatpush1.bf16.msra.mxu0 %v4306_v17  ;;  %2603 = vmatpush1.bf16.msra.mxu1 %v4308_v38 }
 0x5c4   :  { %2857 = vmatprep.subr.bf16.mxu0 %v4218_v14  ;;  %2898 = vmatprep.subr.bf16.mxu1 %v4220_v31 }
 0x679   :  { %v2271_v39 = vpop.f32.mrb[36].mxu0  ;;  %v2312_v51 = vpop.f32.mrb[36].mxu1 }
 0x67a   :  { %v2324_v53 = vadd.f32 %v2271_v39, %v4544_v52  ;;  %v2326_v57 = vadd.f32 %v2312_v51, %v4545_v54  ;;  %v2273_v58 = vpop.f32.mrb[37].mxu0  ;;  %v2314_v59 = vpop.f32.mrb[37].mxu1 }
 0x67b   :  { %v2325_v62 = vadd.f32 %v2273_v58, %v4546_v60  ;;  %v2327_v1 = vadd.f32 %v2314_v59, %v4547_v63  ;;  %v2275_v2 = vpop.f32.mrb[38].mxu0  ;;  %v2316_v5 = vpop.f32.mrb[38].mxu1  ;;  %v4552_v60 = vld [vmem:[#allocation39_spill] sm:$0xff]  ;;  %v4553_v63 = vld [vmem:[#allocation40_spill] sm:$0xff] }
 0x67c   :  { %v3266_v6 = vmul.f32 -1.442695, %v2324_v53  ;;  %v2276_v7 = vpop.f32.mrb[39].mxu0  ;;  %v2317_v9 = vpop.f32.mrb[39].mxu1  ;;  %v3268_v31 = vmul.f32 -1.442695, %v2326_v57 }
 0x67d   :  { %v3267_v14 = vmul.f32 -1.442695, %v2325_v62  ;;  %v4555_v9 = vld [vmem:[#allocation42_spill] sm:$0xff] }
 0x67e   :  { %3575 = vpow2.f32 %v3266_v6  ;;  %v4554_v6 = vld [vmem:[#allocation41_spill] sm:$0xff] }
 0x67f   :  { %3577 = vpow2.f32 %v3267_v14 }
 0x680   :  { %3579 = vpow2.f32 %v3268_v31 }
 0x688   :  { %v3576_v10 = vpop.eup %3575 }
 0x689   :  { %v2331_v12 = vadd.f32 1.0, %v3576_v10  ;;  %v3578_v13 = vpop.eup %3577 }
 0x68a   :  { %v2337_v61 = vadd.f32 1.0, %v3578_v13  ;;  %v3580_v4 = vpop.eup %3579 }
 0x68b   :  { %3581 = vrcp.f32 %v2331_v12  ;;  %v2343_v46 = vadd.f32 1.0, %v3580_v4 }
 0x68c   :  { %3583 = vtanh.f32 %v2327_v1 }
 0x68d   :  { %3585 = vrcp.f32 %v2337_v61 }
 0x68e   :  { %3587 = vrcp.f32 %v2343_v46 }
 0x695   :  { %v3582_v40 = vpop.eup %3581 }
 0x696   :  { %v3584_v41 = vpop.eup %3583  ;;  %v2347_v42 = vmul.f32 %v3582_v40, %v4363_v11 }
 0x697   :  { %v3586_v43 = vpop.eup %3585 }
 0x698   :  { %v2348_v47 = vmul.f32 %v3586_v43, %v3584_v41  ;;  %v3588_v50 = vpop.eup %3587 }
 0x69a   :  { %v4405_v49 = vadd.f32 %v2348_v47, %v2347_v42 }
 0x69c   :  { %3589 = vtanh.f32 %v4405_v49 }
 0x6a6   :  { %v3590_v39 = vpop.eup %3589 }
 0x6a7   :  { %v2351_v51 = vmul.f32 %v3590_v39, %v3588_v50 }
 0x6a9   :  { %2353 = vst [vmem:[#allocation13 + $0x28] sm:$0xff] %v2351_v51  ;;  %v2354_v52 = vpack.c.bf16 %v2351_v51, %v2351_v51 }
 0x6ab   :  { %2580 = vmatmul.mubr.bf16.vlgmr.msra.gmra.mrb[40].mxu0 %v2354_v52  ;;  %2621 = vmatmul.mubr.bf16.vlgmr.msra.gmra.mrb[40].mxu1 %v2354_v52 }
 0x6ac   :  { %2858 = vmatpush1.bf16.msra.mxu0 %v4222_v21  ;;  %2899 = vmatpush1.bf16.msra.mxu1 %v4224_v32  ;;  %v4548_v32 = vld [vmem:[#allocation35_spill] sm:$0xff] }
 0x6ad   :  { %2859 = vmatprep.subr.bf16.mxu0 %v4230_v56  ;;  %2900 = vmatprep.subr.bf16.mxu1 %v4232_v24  ;;  %v4549_v24 = vld [vmem:[#allocation36_spill] sm:$0xff] }
 0x6ae   :  { %2889 = vmatprep.mubr.bf16.mxu0 %v4534_v22  ;;  %2930 = vmatprep.mubr.bf16.mxu1 %v4534_v22 }
 0x6b0   :  { %2860 = vmatpush1.bf16.msra.mxu0 %v4234_v23  ;;  %2901 = vmatpush1.bf16.msra.mxu1 %v4236_v25 }
 0x6b1   :  { %2861 = vmatprep.subr.bf16.mxu0 %v4242_v27  ;;  %2902 = vmatprep.subr.bf16.mxu1 %v4244_v26  ;;  %v4550_v26 = vld [vmem:[#allocation37_spill] sm:$0xff] }
 0x6b4   :  { %2862 = vmatpush1.bf16.msra.mxu0 %v4246_v28  ;;  %2903 = vmatpush1.bf16.msra.mxu1 %v4248_v0  ;;  %v4551_v0 = vld [vmem:[#allocation38_spill] sm:$0xff] }
 0x6b5   :  { %2863 = vmatprep.subr.bf16.mxu0 %v4254_v29  ;;  %2904 = vmatprep.subr.bf16.mxu1 %v4256_v35 }
 0x6b8   :  { %2864 = vmatpush1.bf16.msra.mxu0 %v4258_v36  ;;  %2905 = vmatpush1.bf16.msra.mxu1 %v4260_v30 }
 0x6b9   :  { %2865 = vmatprep.subr.bf16.mxu0 %v4266_v18  ;;  %2906 = vmatprep.subr.bf16.mxu1 %v4268_v33 }
 0x6bc   :  { %2866 = vmatpush1.bf16.msra.mxu0 %v4270_v37  ;;  %2907 = vmatpush1.bf16.msra.mxu1 %v4272_v45 }
 0x6bd   :  { %2867 = vmatprep.subr.bf16.mxu0 %v4280_v48  ;;  %2908 = vmatprep.subr.bf16.mxu1 %v4284_v44 }
 0x6c0   :  { %2868 = vmatpush1.bf16.msra.mxu0 %v4278_v16  ;;  %2909 = vmatpush1.bf16.msra.mxu1 %v4282_v20 }
 0x6c1   :  { %2869 = vmatprep.subr.bf16.mxu0 %v4286_v8  ;;  %2910 = vmatprep.subr.bf16.mxu1 %v4289_v34 }
 0x6c4   :  { %2870 = vmatpush1.bf16.msra.mxu0 %v4294_v3  ;;  %2911 = vmatpush1.bf16.msra.mxu1 %v4296_v19 }
 0x6c5   :  { %2871 = vmatprep.subr.bf16.mxu0 %v4300_v55  ;;  %2912 = vmatprep.subr.bf16.mxu1 %v4302_v15 }
 0x6c8   :  { %2872 = vmatpush1.bf16.msra.mxu0 %v4306_v17  ;;  %2913 = vmatpush1.bf16.msra.mxu1 %v4308_v38 }
 0x77e   :  { %v2581_v22 = vpop.f32.mrb[40].mxu0  ;;  %v2622_v21 = vpop.f32.mrb[40].mxu1 }
 0x77f   :  { %v2634_v56 = vadd.f32 %v2581_v22, %v4548_v32  ;;  %v2636_v23 = vadd.f32 %v2622_v21, %v4549_v24  ;;  %v2583_v25 = vpop.f32.mrb[41].mxu0  ;;  %v2624_v27 = vpop.f32.mrb[41].mxu1 }
 0x780   :  { %v2635_v28 = vadd.f32 %v2583_v25, %v4550_v26  ;;  %v2637_v29 = vadd.f32 %v2624_v27, %v4551_v0  ;;  %v2585_v35 = vpop.f32.mrb[42].mxu0  ;;  %v2626_v36 = vpop.f32.mrb[42].mxu1 }
 0x781   :  { %v3301_v30 = vmul.f32 -1.442695, %v2634_v56  ;;  %v2586_v18 = vpop.f32.mrb[43].mxu0  ;;  %v2627_v33 = vpop.f32.mrb[43].mxu1  ;;  %v3303_v45 = vmul.f32 -1.442695, %v2636_v23 }
 0x782   :  { %v3302_v37 = vmul.f32 -1.442695, %v2635_v28 }
 0x783   :  { %3591 = vpow2.f32 %v3301_v30 }
 0x784   :  { %3593 = vpow2.f32 %v3302_v37 }
 0x785   :  { %3595 = vpow2.f32 %v3303_v45 }
 0x78d   :  { %v3592_v16 = vpop.eup %3591 }
 0x78e   :  { %v2641_v48 = vadd.f32 1.0, %v3592_v16  ;;  %v3594_v20 = vpop.eup %3593 }
 0x78f   :  { %v2647_v44 = vadd.f32 1.0, %v3594_v20  ;;  %v3596_v8 = vpop.eup %3595 }
 0x790   :  { %3597 = vrcp.f32 %v2641_v48  ;;  %v2653_v15 = vadd.f32 1.0, %v3596_v8 }
 0x791   :  { %3599 = vtanh.f32 %v2637_v29 }
 0x792   :  { %3601 = vrcp.f32 %v2647_v44 }
 0x793   :  { %3603 = vrcp.f32 %v2653_v15 }
 0x79a   :  { %v3598_v34 = vpop.eup %3597 }
 0x79b   :  { %v3600_v3 = vpop.eup %3599  ;;  %v2657_v19 = vmul.f32 %v3598_v34, %v4405_v49 }
 0x79c   :  { %v3602_v55 = vpop.eup %3601 }
 0x79d   :  { %v2658_v17 = vmul.f32 %v3602_v55, %v3600_v3  ;;  %v3604_v11 = vpop.eup %3603 }
 0x79f   :  { %v2659_v38 = vadd.f32 %v2658_v17, %v2657_v19 }
 0x7a1   :  { %3605 = vtanh.f32 %v2659_v38 }
 0x7ab   :  { %v3606_v53 = vpop.eup %3605 }
 0x7ac   :  { %v2661_v54 = vmul.f32 %v3606_v53, %v3604_v11 }
 0x7ae   :  { %2663 = vst [vmem:[#allocation13 + $0x30] sm:$0xff] %v2661_v54  ;;  %v2664_v57 = vpack.c.bf16 %v2661_v54, %v2661_v54 }
 0x7b0   :  { %2890 = vmatmul.mubr.bf16.vlgmr.msra.gmra.mrb[44].mxu0 %v2664_v57  ;;  %2931 = vmatmul.mubr.bf16.vlgmr.msra.gmra.mrb[44].mxu1 %v2664_v57 }
 0x883   :  { %v2891_v58 = vpop.f32.mrb[44].mxu0  ;;  %v2932_v59 = vpop.f32.mrb[44].mxu1 }
 0x884   :  { %v2944_v62 = vadd.f32 %v2891_v58, %v4552_v60  ;;  %v2946_v1 = vadd.f32 %v2932_v59, %v4553_v63  ;;  %v2893_v2 = vpop.f32.mrb[45].mxu0  ;;  %v2934_v5 = vpop.f32.mrb[45].mxu1 }
 0x885   :  { %v2945_v7 = vadd.f32 %v2893_v2, %v4554_v6  ;;  %v2947_v14 = vadd.f32 %v2934_v5, %v4555_v9  ;;  %v2895_v31 = vpop.f32.mrb[46].mxu0  ;;  %v2936_v10 = vpop.f32.mrb[46].mxu1 }
 0x886   :  { %v3336_v12 = vmul.f32 -1.442695, %v2944_v62  ;;  %v2896_v13 = vpop.f32.mrb[47].mxu0  ;;  %v2937_v61 = vpop.f32.mrb[47].mxu1  ;;  %v3338_v40 = vmul.f32 -1.442695, %v2946_v1 }
 0x887   :  { %v3337_v4 = vmul.f32 -1.442695, %v2945_v7 }
 0x888   :  { %3607 = vpow2.f32 %v3336_v12 }
 0x889   :  { %3609 = vpow2.f32 %v3337_v4 }
 0x88a   :  { %3611 = vpow2.f32 %v3338_v40 }
 0x892   :  { %v3608_v41 = vpop.eup %3607 }
 0x893   :  { %v2951_v42 = vadd.f32 1.0, %v3608_v41  ;;  %v3610_v43 = vpop.eup %3609 }
 0x894   :  { %v2957_v46 = vadd.f32 1.0, %v3610_v43  ;;  %v3612_v47 = vpop.eup %3611 }
 0x895   :  { %3613 = vrcp.f32 %v2951_v42  ;;  %v2963_v52 = vadd.f32 1.0, %v3612_v47 }
 0x896   :  { %3615 = vtanh.f32 %v2947_v14 }
 0x897   :  { %3617 = vrcp.f32 %v2957_v46 }
 0x898   :  { %3619 = vrcp.f32 %v2963_v52 }
 0x89f   :  { %v3614_v49 = vpop.eup %3613 }
 0x8a0   :  { %v3616_v50 = vpop.eup %3615  ;;  %v2967_v39 = vmul.f32 %v3614_v49, %v2659_v38 }
 0x8a1   :  { %v3618_v51 = vpop.eup %3617 }
 0x8a2   :  { %v2968_v22 = vmul.f32 %v3618_v51, %v3616_v50  ;;  %v3620_v32 = vpop.eup %3619 }
 0x8a4   :  { %v2969_v21 = vadd.f32 %v2968_v22, %v2967_v39 }
 0x8a6   :  { %2980 = vst [vmem:[#allocation16] sm:$0xff] %v2969_v21  ;;  %3621 = vtanh.f32 %v2969_v21 }
 0x8b0   :  { %v3622_v56 = vpop.eup %3621 }
 0x8b1   :  { %v2971_v24 = vmul.f32 %v3622_v56, %v3620_v32 }
 0x8b3   :  { %2973 = vst [vmem:[#allocation13 + $0x38] sm:$0xff] %v2971_v24  ;;  %2979 = vst [vmem:[#allocation14] sm:$0xff] %v2971_v24 }
 0x8b4   :  { %3722 = shalt.err (!%p3719_p8)
}
 0x8b5   :  { %s3723_s0 = scalar_lea.hbm %s4509_s7, 128 }
 0x8b6   :  { %p3724_p9 = scmp.ne.s32.totalorder %s4509_s7, %s3723_s0  ;;  %p3727_p10 = scmp.lt.u32.totalorder %s3723_s0, %s4509_s7 }
 0x8b8   :  { %p3729_p11 = pnand %p3727_p10, %p3724_p9 }
 0x8ba   :  { %3732 = shalt.err (!%p3729_p11)
}
 0x8bb   :  { %3002 = dma.vmem_to_hbm [thread:$0]  %s3000_s13, 128, %s4509_s7, [#allocation15]  }
 0x8bc   :  { %s3733_s30 = scalar_lea.vmem %s4449_s17, 1024  ;;  %p3738_p13 = scmp.lt.s32.totalorder %s4449_s17, %s4449_s17 }
 0x8bd   :  { %p3734_p12 = scmp.ne.s32.totalorder %s4449_s17, %s3733_s30  ;;  %p3739_p0 = scmp.lt.s32.totalorder %s3733_s30, %s3733_s30 }
 0x8bf   :  { %p3740_p1 = por %p3739_p0, %p3738_p13 }
 0x8c1   :  { %p3741_p2 = pnand %p3740_p1, %p3734_p12 }
 0x8c3   :  { %3744 = shalt.err (!%p3741_p2)
}
 0x8c4   :  { %s3745_s12 = scalar_lea.hbm %s4508_s6, 1024 }
 0x8c5   :  { %p3746_p3 = scmp.ne.s32.totalorder %s4508_s6, %s3745_s12  ;;  %p3749_p4 = scmp.lt.u32.totalorder %s3745_s12, %s4508_s6 }
 0x8c7   :  { %p3751_p5 = pnand %p3749_p4, %p3746_p3 }
 0x8c9   :  { %3754 = shalt.err (!%p3751_p5)
}
 0x8ca   :  { %2992 = dma.vmem_to_hbm [thread:$0]  %s4449_s17, 1024, %s4508_s6, [#allocation7], %s3791_s1, %s3791_s1, %s3792_s28  }
 0x8cb   :  { %s3755_s11 = scalar_lea.vmem %s4451_s19, 128  ;;  %p3760_p7 = scmp.lt.s32.totalorder %s4451_s19, %s4451_s19 }
 0x8cc   :  { %p3756_p6 = scmp.ne.s32.totalorder %s4451_s19, %s3755_s11  ;;  %p3761_p8 = scmp.lt.s32.totalorder %s3755_s11, %s3755_s11 }
 0x8ce   :  { %p3762_p9 = por %p3761_p8, %p3760_p7 }
 0x8d0   :  { %p3763_p10 = pnand %p3762_p9, %p3756_p6 }
 0x8d2   :  { %3766 = shalt.err (!%p3763_p10)
}
 0x8d3   :  { %s3767_s14 = scalar_lea.hbm %s4510_s8, 128 }
 0x8d4   :  { %p3768_p11 = scmp.ne.s32.totalorder %s4510_s8, %s3767_s14  ;;  %p3771_p12 = scmp.lt.u32.totalorder %s3767_s14, %s4510_s8 }
 0x8d6   :  { %p3773_p13 = pnand %p3771_p12, %p3768_p11 }
 0x8d8   :  { %3776 = shalt.err (!%p3773_p13)
}
 0x8d9   :  { %3012 = dma.vmem_to_hbm [thread:$0]  %s4451_s19, 128, %s4510_s8, [#allocation15]  }
 0x8da   :  { %3783 = dma.done.wait [#allocation7], 1024  }
 0x8db   :  { %3784 = vsyncadd [#allocation7], 4294966272 }
 0x8dc   :  { %3785 = dma.done.wait [#allocation15], 256  }
 0x8dd   :  { %3786 = vsyncadd [#allocation15], 4294967040 }
 0x8de   :  { %3022 = vsyncpa [#allocation6], 1 }
 0x8df   :  { %3023 = vsyncpa [#allocation9], 1 }
 0x8e0   :  { %3024 = vsyncpa [#allocation12], 1 }
 0x8e1   :  { %3025 = vsyncpa [#allocation7], 1 }
 0x8e2   :  { %3026 = vsyncpa [#allocation15], 1 }

</bundles_post_ra>
